<compile_context>
chip_gen: v6e
topology: v6e:2x2x1
jax: 0.10.0
libtpu: 0.0.40
codegen_flags: <defaults>
</compile_context>

<pallas_src>
import functools

import jax
import jax.numpy as jnp
from jax.experimental import pallas as pl
from jax.experimental.pallas import tpu as pltpu


def _round_up(x, m):
    return (x + m - 1) // m * m


def _pad_gate_cols(w, h, h_pad):
    """Split last axis (4*h) into the 4 gate blocks and zero-pad each to h_pad lanes."""
    pad = [(0, 0)] * (w.ndim - 1) + [(0, h_pad - h)]
    return jnp.concatenate(
        [jnp.pad(w[..., g * h:(g + 1) * h], pad) for g in range(4)], axis=-1)


def _vmem_limit_bytes():
    """Generation-aware scoped-VMEM limit (v5e/v6e: 128 MiB physical, v7x: 64 MiB)."""
    try:
        cap = int(pltpu.get_tpu_info().vmem_capacity_bytes)
    except Exception:
        return 32 * 1024 * 1024
    return min(100 * 1024 * 1024, max(32 * 1024 * 1024, cap * 7 // 8))


def _sigmoid(x):
    # Single EUP tanh push instead of exp + divide on the serial recurrence.
    return 0.5 * jnp.tanh(0.5 * x) + 0.5


# ------------------------------ Pallas kernel ------------------------------- #

def lstm_decoder_kernel(xg_ref, h0_ref, c0_ref, whh_ref, fcw_ref, fcb_ref,
                        out_ref, hn_ref, cn_ref, hcat_ref,
                        *, seq_len, batch_tile):
    """Single-layer LSTM recurrence + fc for one batch tile.

    xg_ref  : (T, BT, 4Hp) f32   precomputed input gates (emb@W_ih^T gathered + bias)
    h0_ref  : (BT, Hp)     f32
    c0_ref  : (BT, Hp)     f32
    whh_ref : (Hp, 4Hp)    bf16  W_hh^T, gate-block padded
    fcw_ref : (Hp, Op)     bf16  fc weight^T
    fcb_ref : (1, Op)      f32   fc bias
    out_ref : (T, BT, Op)  f32
    hn_ref / cn_ref : (BT, Hp) f32
    hcat_ref: (T*BT, Hp)   f32   VMEM scratch holding the h history
    """
    T, BT = seq_len, batch_tile
    Hp = h0_ref.shape[-1]

    h = h0_ref[...]                       # (BT, Hp) f32
    c = c0_ref[...]

    # TODO(synk): for large T switch to lax.fori_loop(unroll=2..4) carrying (h, c).
    for t in range(T):                    # fully unrolled: T is small & static
        # Per-step input gates read straight from VMEM; recurrent dot in bf16
        # with f32 accumulate (serial critical path -> halve MXU passes).
        gates = xg_ref[t] + jnp.dot(h.astype(jnp.bfloat16), whh_ref[...],
                                    preferred_element_type=jnp.float32)
        # PyTorch gate order: i, f, g, o -- each gate is a whole 128-lane block.
        i = _sigmoid(gates[:, 0 * Hp:1 * Hp])
        f = _sigmoid(gates[:, 1 * Hp:2 * Hp])
        g = jnp.tanh(gates[:, 2 * Hp:3 * Hp])
        o = _sigmoid(gates[:, 3 * Hp:4 * Hp])
        c = f * c + i * g                 # f32 cell/gate math on all chips
        h = o * jnp.tanh(c)
        hcat_ref[t * BT:(t + 1) * BT, :] = h   # h history -> VMEM scratch

    hn_ref[...] = h
    cn_ref[...] = c

    # fc over all timesteps of this batch tile as one lane-dense bf16 matmul.
    fc = jnp.dot(hcat_ref[...].astype(jnp.bfloat16), fcw_ref[...],
                 preferred_element_type=jnp.float32) + fcb_ref[...]
    out_ref[...] = fc.reshape(out_ref.shape)      # (T*BT,Op) -> (T,BT,Op), layout-free


# --------------------------------- wrapper ----------------------------------- #

def lstm_decoder_forward(x, h0, c0, params, *, batch_tile=8):
    """x: (B, T) int32 tokens; h0, c0: (1, B, H) float32.

    Returns (out, (h_n, c_n)) matching the PyTorch module:
      out (B, T, output_dim), h_n / c_n (1, B, H).
    """
    B, T = x.shape
    V, H = params["emb"].shape                 # V == output_dim (decoder vocab)
    O = params["fc_w_t"].shape[1]

    BT = batch_tile                            # sublane-aligned batch tile
    Bp = _round_up(max(B, BT), BT)
    Hp = _round_up(H, 128)
    Op = _round_up(O, 128)

    # ---- input path hoisted to XLA: fold embedding into W_ih, gather + bias ----
    # (kernel never sees the vocab dim; scales to real vocab sizes / v7x VMEM.)
    fused = params["emb"] @ params["wih_t"]                              # (V, 4H)
    fused_p = _pad_gate_cols(fused, H, Hp)                               # (V, 4Hp)
    b_p = _pad_gate_cols(params["b_ih"] + params["b_hh"], H, Hp)         # (1, 4Hp)

    tok = jnp.transpose(x, (1, 0)).astype(jnp.int32)                     # (T, B) time-major
    tok = jnp.pad(tok, ((0, 0), (0, Bp - B)))                            # (T, Bp)
    xg = fused_p[tok] + b_p                                              # (T, Bp, 4Hp) f32

    # ---- weights: gate-block padded; MXU operands cast to bf16 ----
    whh_p = _pad_gate_cols(
        jnp.pad(params["whh_t"], ((0, Hp - H), (0, 0))), H, Hp)          # (Hp, 4Hp)
    fcw_p = jnp.pad(params["fc_w_t"], ((0, Hp - H), (0, Op - O)))        # (Hp, Op)
    fcb_p = jnp.pad(params["fc_b"], ((0, 0), (0, Op - O)))               # (1, Op)
    whh_bf = whh_p.astype(jnp.bfloat16)
    fcw_bf = fcw_p.astype(jnp.bfloat16)

    h0_p = jnp.pad(h0[0], ((0, Bp - B), (0, Hp - H)))                    # (Bp, Hp)
    c0_p = jnp.pad(c0[0], ((0, Bp - B), (0, Hp - H)))

    inputs = (xg, h0_p, c0_p, whh_bf, fcw_bf, fcb_p)

    flops = int(2 * T * Bp * Hp * 4 * Hp         # recurrent matmuls
                + 2 * T * Bp * Hp * Op           # fc matmul
                + 10 * T * Bp * Hp)              # elementwise gate math
    transcendentals = int(5 * T * Bp * Hp)       # 5 tanh (3 sigmoid-as-tanh + 2 tanh)
    bytes_accessed = int(4 * (xg.size + h0_p.size + c0_p.size + fcb_p.size
                              + T * Bp * Op + 2 * Bp * Hp)
                         + 2 * (whh_bf.size + fcw_bf.size))

    n_tiles = Bp // BT
    # Batch multiple sequences into one call where possible: the serial-loop
    # latency is nearly flat in Bp up to MXU height, so filling sublanes is free.
    out_tm, hn, cn = pl.pallas_call(
        functools.partial(lstm_decoder_kernel, seq_len=T, batch_tile=BT),
        out_shape=(jax.ShapeDtypeStruct((T, Bp, Op), jnp.float32),
                   jax.ShapeDtypeStruct((Bp, Hp), jnp.float32),
                   jax.ShapeDtypeStruct((Bp, Hp), jnp.float32)),
        grid=(n_tiles,),                                   # parallel batch tiles
        in_specs=[
            pl.BlockSpec((T, BT, 4 * Hp), lambda b: (0, b, 0)),   # xg
            pl.BlockSpec((BT, Hp), lambda b: (b, 0)),             # h0
            pl.BlockSpec((BT, Hp), lambda b: (b, 0)),             # c0
            pl.BlockSpec((Hp, 4 * Hp), lambda b: (0, 0)),         # W_hh^T (bf16)
            pl.BlockSpec((Hp, Op), lambda b: (0, 0)),             # fc W^T (bf16)
            pl.BlockSpec((1, Op), lambda b: (0, 0)),              # fc bias
        ],
        out_specs=(
            pl.BlockSpec((T, BT, Op), lambda b: (0, b, 0)),       # out (time-major)
            pl.BlockSpec((BT, Hp), lambda b: (b, 0)),             # h_n
            pl.BlockSpec((BT, Hp), lambda b: (b, 0)),             # c_n
        ),
        scratch_shapes=[pltpu.VMEM((T * BT, Hp), jnp.float32)],   # h history
        compiler_params=pltpu.CompilerParams(
            dimension_semantics=("parallel",),                    # 2 TCs on v7x
            vmem_limit_bytes=_vmem_limit_bytes()),
        cost_estimate=pl.CostEstimate(flops=flops,
                                      transcendentals=transcendentals,
                                      bytes_accessed=bytes_accessed),
    )(*inputs)

    # Drop batch/lane padding; single output transpose to the module's (B, T, O).
    out = jnp.transpose(out_tm[:, :B, :O], (1, 0, 2))
    h_n = hn[:B, :H][None]                            # (1, B, H)
    c_n = cn[:B, :H][None]
    return out, (h_n, c_n)


# ------------------------------ parameter init ------------------------------- #

def init_params(key, output_dim, hidden_dim, pad_token_id):
    ks = jax.random.split(key, 7)
    s = 1.0 / float(hidden_dim) ** 0.5
    u = lambda k, shape: jax.random.uniform(k, shape, jnp.float32, -s, s)
    H = hidden_dim
    emb = u(ks[0], (output_dim, H)).at[pad_token_id].set(0.0)   # padding_idx row
    return dict(
        emb=emb,                                 # (output_dim, H)
        wih_t=u(ks[1], (H, 4 * H)),              # W_ih^T
        whh_t=u(ks[2], (H, 4 * H)),              # W_hh^T
        b_ih=u(ks[3], (1, 4 * H)),
        b_hh=u(ks[4], (1, 4 * H)),
        fc_w_t=u(ks[5], (H, output_dim)),        # fc weight^T
        fc_b=u(ks[6], (1, output_dim)),
    )


# ---------------------------- pure-JAX reference ------------------------------ #

def reference_forward(x, h0, c0, p):
    B, T = x.shape
    H = p["whh_t"].shape[0]
    emb = p["emb"][x]                            # (B, T, H)
    b = p["b_ih"] + p["b_hh"]
    h, c = h0[0], c0[0]
    outs = []
    for t in range(T):
        gates = emb[:, t] @ p["wih_t"] + h @ p["whh_t"] + b
        i = jax.nn.sigmoid(gates[:, 0 * H:1 * H])
        f = jax.nn.sigmoid(gates[:, 1 * H:2 * H])
        g = jnp.tanh(gates[:, 2 * H:3 * H])
        o = jax.nn.sigmoid(gates[:, 3 * H:4 * H])
        c = f * c + i * g
        h = o * jnp.tanh(c)
        outs.append(h @ p["fc_w_t"] + p["fc_b"])
    out = jnp.stack(outs, axis=1)                # (B, T, output_dim)
    return out, (h[None], c[None])


# ----------------------------------- main ------------------------------------- #

if __name__ == "__main__":
    BATCH, SEQ_LEN = 2, 8
    OUTPUT_DIM, HIDDEN, PAD_ID = 16, 32, 0

    key = jax.random.PRNGKey(0)
    kx, kh, kc, kp = jax.random.split(key, 4)
    x = jax.random.randint(kx, (BATCH, SEQ_LEN), 0, OUTPUT_DIM, jnp.int32)
    h0 = jax.random.normal(kh, (1, BATCH, HIDDEN), jnp.float32)
    c0 = jax.random.normal(kc, (1, BATCH, HIDDEN), jnp.float32)
    params = init_params(kp, OUTPUT_DIM, HIDDEN, PAD_ID)

    out, (h_n, c_n) = lstm_decoder_forward(x, h0, c0, params)
    out = jax.block_until_ready(out)
    h_n = jax.block_until_ready(h_n)
    c_n = jax.block_until_ready(c_n)

    assert out.shape == (BATCH, SEQ_LEN, OUTPUT_DIM)
    assert h_n.shape == (1, BATCH, HIDDEN)
    assert c_n.shape == (1, BATCH, HIDDEN)

    ref_out, (ref_h, ref_c) = reference_forward(x, h0, c0, params)
    # bf16 MXU operands -> tolerance loosened vs the old f32-only check.
    ok = (jnp.allclose(out, ref_out, atol=3e-2, rtol=3e-2)
          and jnp.allclose(h_n, ref_h, atol=3e-2, rtol=3e-2)
          and jnp.allclose(c_n, ref_c, atol=3e-2, rtol=3e-2))
    if not ok:
        print("WARNING: kernel output differs from pure-JAX reference")

    print("KERNEL_OK")
</pallas_src>

<mosaic_0001>
module attributes {stable_mosaic.version = 11 : i64} {
  func.func @lstm_decoder_kernel(%arg0: i32, %arg1: memref<8x8x512xf32, #tpu.memory_space<vmem>>, %arg2: memref<8x128xf32, #tpu.memory_space<vmem>>, %arg3: memref<8x128xf32, #tpu.memory_space<vmem>>, %arg4: memref<128x512xbf16, #tpu.memory_space<vmem>>, %arg5: memref<128x128xbf16, #tpu.memory_space<vmem>>, %arg6: memref<1x128xf32, #tpu.memory_space<vmem>>, %arg7: memref<8x8x128xf32, #tpu.memory_space<vmem>>, %arg8: memref<8x128xf32, #tpu.memory_space<vmem>>, %arg9: memref<8x128xf32, #tpu.memory_space<vmem>>, %arg10: memref<64x128xf32, #tpu.memory_space<vmem>>) attributes {dimension_semantics = [#tpu.dimension_semantics<parallel>], iteration_bounds = array<i64: 1>, scalar_prefetch = 0 : i64, scratch_operands = 1 : i64, tpu.core_type = #tpu.core_type<tc>, window_params = [{transform_indices = @transform_0, window_bounds = array<i64: 8, 8, 512>}, {transform_indices = @transform_1, window_bounds = array<i64: 8, 128>}, {transform_indices = @transform_2, window_bounds = array<i64: 8, 128>}, {pipeline_mode = #tpu.pipeline_mode<synchronous>, transform_indices = @transform_3, window_bounds = array<i64: 128, 512>}, {pipeline_mode = #tpu.pipeline_mode<synchronous>, transform_indices = @transform_4, window_bounds = array<i64: 128, 128>}, {pipeline_mode = #tpu.pipeline_mode<synchronous>, transform_indices = @transform_5, window_bounds = array<i64: 1, 128>}, {transform_indices = @transform_6, window_bounds = array<i64: 8, 8, 128>}, {transform_indices = @transform_7, window_bounds = array<i64: 8, 128>}, {transform_indices = @transform_8, window_bounds = array<i64: 8, 128>}]} {
    %c0 = arith.constant 0 : index
    %c0_0 = arith.constant 0 : index
    %0 = vector.load %arg2[%c0, %c0_0] : memref<8x128xf32, #tpu.memory_space<vmem>>, vector<8x128xf32>
    %c0_1 = arith.constant 0 : index
    %c0_2 = arith.constant 0 : index
    %1 = vector.load %arg3[%c0_1, %c0_2] : memref<8x128xf32, #tpu.memory_space<vmem>>, vector<8x128xf32>
    %c0_3 = arith.constant 0 : index
    %c0_4 = arith.constant 0 : index
    %c0_5 = arith.constant 0 : index
    %2 = vector.load %arg1[%c0_3, %c0_4, %c0_5] : memref<8x8x512xf32, #tpu.memory_space<vmem>>, vector<1x8x512xf32>
    %3 = vector.shape_cast %2 : vector<1x8x512xf32> to vector<8x512xf32>
    %4 = arith.truncf %0 : vector<8x128xf32> to vector<8x128xbf16>
    %c0_6 = arith.constant 0 : index
    %c0_7 = arith.constant 0 : index
    %5 = vector.load %arg4[%c0_6, %c0_7] : memref<128x512xbf16, #tpu.memory_space<vmem>>, vector<128x512xbf16>
    %cst = arith.constant dense<0.000000e+00> : vector<8x512xf32>
    %6 = tpu.matmul %4, %5, %cst {dimension_numbers = #tpu.dot_dimension_numbers<[1], [0], [0], [1], [0, 0, 1, 1], [], []>} : vector<8x128xbf16>, vector<128x512xbf16>, vector<8x512xf32> -> vector<8x512xf32>
    %7 = arith.addf %3, %6 : vector<8x512xf32>
    %8 = vector.extract_strided_slice %7 {offsets = [0, 0], sizes = [8, 128], strides = [1, 1]} : vector<8x512xf32> to vector<8x128xf32>
    %cst_8 = arith.constant 5.000000e-01 : f32
    %9 = vector.broadcast %cst_8 : f32 to vector<8x128xf32>
    %10 = arith.mulf %9, %8 : vector<8x128xf32>
    %11 = math.tanh %10 : vector<8x128xf32>
    %cst_9 = arith.constant 5.000000e-01 : f32
    %12 = vector.broadcast %cst_9 : f32 to vector<8x128xf32>
    %13 = arith.mulf %12, %11 : vector<8x128xf32>
    %cst_10 = arith.constant 5.000000e-01 : f32
    %14 = vector.broadcast %cst_10 : f32 to vector<8x128xf32>
    %15 = arith.addf %13, %14 : vector<8x128xf32>
    %16 = vector.extract_strided_slice %7 {offsets = [0, 128], sizes = [8, 128], strides = [1, 1]} : vector<8x512xf32> to vector<8x128xf32>
    %cst_11 = arith.constant 5.000000e-01 : f32
    %17 = vector.broadcast %cst_11 : f32 to vector<8x128xf32>
    %18 = arith.mulf %17, %16 : vector<8x128xf32>
    %19 = math.tanh %18 : vector<8x128xf32>
    %cst_12 = arith.constant 5.000000e-01 : f32
    %20 = vector.broadcast %cst_12 : f32 to vector<8x128xf32>
    %21 = arith.mulf %20, %19 : vector<8x128xf32>
    %cst_13 = arith.constant 5.000000e-01 : f32
    %22 = vector.broadcast %cst_13 : f32 to vector<8x128xf32>
    %23 = arith.addf %21, %22 : vector<8x128xf32>
    %24 = vector.extract_strided_slice %7 {offsets = [0, 256], sizes = [8, 128], strides = [1, 1]} : vector<8x512xf32> to vector<8x128xf32>
    %25 = math.tanh %24 : vector<8x128xf32>
    %26 = vector.extract_strided_slice %7 {offsets = [0, 384], sizes = [8, 128], strides = [1, 1]} : vector<8x512xf32> to vector<8x128xf32>
    %cst_14 = arith.constant 5.000000e-01 : f32
    %27 = vector.broadcast %cst_14 : f32 to vector<8x128xf32>
    %28 = arith.mulf %27, %26 : vector<8x128xf32>
    %29 = math.tanh %28 : vector<8x128xf32>
    %cst_15 = arith.constant 5.000000e-01 : f32
    %30 = vector.broadcast %cst_15 : f32 to vector<8x128xf32>
    %31 = arith.mulf %30, %29 : vector<8x128xf32>
    %cst_16 = arith.constant 5.000000e-01 : f32
    %32 = vector.broadcast %cst_16 : f32 to vector<8x128xf32>
    %33 = arith.addf %31, %32 : vector<8x128xf32>
    %34 = arith.mulf %23, %1 : vector<8x128xf32>
    %35 = arith.mulf %15, %25 : vector<8x128xf32>
    %36 = arith.addf %34, %35 : vector<8x128xf32>
    %37 = math.tanh %36 : vector<8x128xf32>
    %38 = arith.mulf %33, %37 : vector<8x128xf32>
    %c0_17 = arith.constant 0 : index
    %c0_18 = arith.constant 0 : index
    %39 = vector.load %arg10[%c0_17, %c0_18] : memref<64x128xf32, #tpu.memory_space<vmem>>, vector<8x128xf32>
    tpu.vector_store %arg10[%c0_17, %c0_18], %38 {strides = array<i32>} : memref<64x128xf32, #tpu.memory_space<vmem>>, vector<8x128xf32>,
    %c1 = arith.constant 1 : index
    %c0_19 = arith.constant 0 : index
    %c0_20 = arith.constant 0 : index
    %40 = vector.load %arg1[%c1, %c0_19, %c0_20] : memref<8x8x512xf32, #tpu.memory_space<vmem>>, vector<1x8x512xf32>
    %41 = vector.shape_cast %40 : vector<1x8x512xf32> to vector<8x512xf32>
    %42 = arith.truncf %38 : vector<8x128xf32> to vector<8x128xbf16>
    %c0_21 = arith.constant 0 : index
    %c0_22 = arith.constant 0 : index
    %43 = vector.load %arg4[%c0_21, %c0_22] : memref<128x512xbf16, #tpu.memory_space<vmem>>, vector<128x512xbf16>
    %cst_23 = arith.constant dense<0.000000e+00> : vector<8x512xf32>
    %44 = tpu.matmul %42, %43, %cst_23 {dimension_numbers = #tpu.dot_dimension_numbers<[1], [0], [0], [1], [0, 0, 1, 1], [], []>} : vector<8x128xbf16>, vector<128x512xbf16>, vector<8x512xf32> -> vector<8x512xf32>
    %45 = arith.addf %41, %44 : vector<8x512xf32>
    %46 = vector.extract_strided_slice %45 {offsets = [0, 0], sizes = [8, 128], strides = [1, 1]} : vector<8x512xf32> to vector<8x128xf32>
    %cst_24 = arith.constant 5.000000e-01 : f32
    %47 = vector.broadcast %cst_24 : f32 to vector<8x128xf32>
    %48 = arith.mulf %47, %46 : vector<8x128xf32>
    %49 = math.tanh %48 : vector<8x128xf32>
    %cst_25 = arith.constant 5.000000e-01 : f32
    %50 = vector.broadcast %cst_25 : f32 to vector<8x128xf32>
    %51 = arith.mulf %50, %49 : vector<8x128xf32>
    %cst_26 = arith.constant 5.000000e-01 : f32
    %52 = vector.broadcast %cst_26 : f32 to vector<8x128xf32>
    %53 = arith.addf %51, %52 : vector<8x128xf32>
    %54 = vector.extract_strided_slice %45 {offsets = [0, 128], sizes = [8, 128], strides = [1, 1]} : vector<8x512xf32> to vector<8x128xf32>
    %cst_27 = arith.constant 5.000000e-01 : f32
    %55 = vector.broadcast %cst_27 : f32 to vector<8x128xf32>
    %56 = arith.mulf %55, %54 : vector<8x128xf32>
    %57 = math.tanh %56 : vector<8x128xf32>
    %cst_28 = arith.constant 5.000000e-01 : f32
    %58 = vector.broadcast %cst_28 : f32 to vector<8x128xf32>
    %59 = arith.mulf %58, %57 : vector<8x128xf32>
    %cst_29 = arith.constant 5.000000e-01 : f32
    %60 = vector.broadcast %cst_29 : f32 to vector<8x128xf32>
    %61 = arith.addf %59, %60 : vector<8x128xf32>
    %62 = vector.extract_strided_slice %45 {offsets = [0, 256], sizes = [8, 128], strides = [1, 1]} : vector<8x512xf32> to vector<8x128xf32>
    %63 = math.tanh %62 : vector<8x128xf32>
    %64 = vector.extract_strided_slice %45 {offsets = [0, 384], sizes = [8, 128], strides = [1, 1]} : vector<8x512xf32> to vector<8x128xf32>
    %cst_30 = arith.constant 5.000000e-01 : f32
    %65 = vector.broadcast %cst_30 : f32 to vector<8x128xf32>
    %66 = arith.mulf %65, %64 : vector<8x128xf32>
    %67 = math.tanh %66 : vector<8x128xf32>
    %cst_31 = arith.constant 5.000000e-01 : f32
    %68 = vector.broadcast %cst_31 : f32 to vector<8x128xf32>
    %69 = arith.mulf %68, %67 : vector<8x128xf32>
    %cst_32 = arith.constant 5.000000e-01 : f32
    %70 = vector.broadcast %cst_32 : f32 to vector<8x128xf32>
    %71 = arith.addf %69, %70 : vector<8x128xf32>
    %72 = arith.mulf %61, %36 : vector<8x128xf32>
    %73 = arith.mulf %53, %63 : vector<8x128xf32>
    %74 = arith.addf %72, %73 : vector<8x128xf32>
    %75 = math.tanh %74 : vector<8x128xf32>
    %76 = arith.mulf %71, %75 : vector<8x128xf32>
    %c8 = arith.constant 8 : index
    %c0_33 = arith.constant 0 : index
    %77 = vector.load %arg10[%c8, %c0_33] : memref<64x128xf32, #tpu.memory_space<vmem>>, vector<8x128xf32>
    tpu.vector_store %arg10[%c8, %c0_33], %76 {strides = array<i32>} : memref<64x128xf32, #tpu.memory_space<vmem>>, vector<8x128xf32>,
    %c2 = arith.constant 2 : index
    %c0_34 = arith.constant 0 : index
    %c0_35 = arith.constant 0 : index
    %78 = vector.load %arg1[%c2, %c0_34, %c0_35] : memref<8x8x512xf32, #tpu.memory_space<vmem>>, vector<1x8x512xf32>
    %79 = vector.shape_cast %78 : vector<1x8x512xf32> to vector<8x512xf32>
    %80 = arith.truncf %76 : vector<8x128xf32> to vector<8x128xbf16>
    %c0_36 = arith.constant 0 : index
    %c0_37 = arith.constant 0 : index
    %81 = vector.load %arg4[%c0_36, %c0_37] : memref<128x512xbf16, #tpu.memory_space<vmem>>, vector<128x512xbf16>
    %cst_38 = arith.constant dense<0.000000e+00> : vector<8x512xf32>
    %82 = tpu.matmul %80, %81, %cst_38 {dimension_numbers = #tpu.dot_dimension_numbers<[1], [0], [0], [1], [0, 0, 1, 1], [], []>} : vector<8x128xbf16>, vector<128x512xbf16>, vector<8x512xf32> -> vector<8x512xf32>
    %83 = arith.addf %79, %82 : vector<8x512xf32>
    %84 = vector.extract_strided_slice %83 {offsets = [0, 0], sizes = [8, 128], strides = [1, 1]} : vector<8x512xf32> to vector<8x128xf32>
    %cst_39 = arith.constant 5.000000e-01 : f32
    %85 = vector.broadcast %cst_39 : f32 to vector<8x128xf32>
    %86 = arith.mulf %85, %84 : vector<8x128xf32>
    %87 = math.tanh %86 : vector<8x128xf32>
    %cst_40 = arith.constant 5.000000e-01 : f32
    %88 = vector.broadcast %cst_40 : f32 to vector<8x128xf32>
    %89 = arith.mulf %88, %87 : vector<8x128xf32>
    %cst_41 = arith.constant 5.000000e-01 : f32
    %90 = vector.broadcast %cst_41 : f32 to vector<8x128xf32>
    %91 = arith.addf %89, %90 : vector<8x128xf32>
    %92 = vector.extract_strided_slice %83 {offsets = [0, 128], sizes = [8, 128], strides = [1, 1]} : vector<8x512xf32> to vector<8x128xf32>
    %cst_42 = arith.constant 5.000000e-01 : f32
    %93 = vector.broadcast %cst_42 : f32 to vector<8x128xf32>
    %94 = arith.mulf %93, %92 : vector<8x128xf32>
    %95 = math.tanh %94 : vector<8x128xf32>
    %cst_43 = arith.constant 5.000000e-01 : f32
    %96 = vector.broadcast %cst_43 : f32 to vector<8x128xf32>
    %97 = arith.mulf %96, %95 : vector<8x128xf32>
    %cst_44 = arith.constant 5.000000e-01 : f32
    %98 = vector.broadcast %cst_44 : f32 to vector<8x128xf32>
    %99 = arith.addf %97, %98 : vector<8x128xf32>
    %100 = vector.extract_strided_slice %83 {offsets = [0, 256], sizes = [8, 128], strides = [1, 1]} : vector<8x512xf32> to vector<8x128xf32>
    %101 = math.tanh %100 : vector<8x128xf32>
    %102 = vector.extract_strided_slice %83 {offsets = [0, 384], sizes = [8, 128], strides = [1, 1]} : vector<8x512xf32> to vector<8x128xf32>
    %cst_45 = arith.constant 5.000000e-01 : f32
    %103 = vector.broadcast %cst_45 : f32 to vector<8x128xf32>
    %104 = arith.mulf %103, %102 : vector<8x128xf32>
    %105 = math.tanh %104 : vector<8x128xf32>
    %cst_46 = arith.constant 5.000000e-01 : f32
    %106 = vector.broadcast %cst_46 : f32 to vector<8x128xf32>
    %107 = arith.mulf %106, %105 : vector<8x128xf32>
    %cst_47 = arith.constant 5.000000e-01 : f32
    %108 = vector.broadcast %cst_47 : f32 to vector<8x128xf32>
    %109 = arith.addf %107, %108 : vector<8x128xf32>
    %110 = arith.mulf %99, %74 : vector<8x128xf32>
    %111 = arith.mulf %91, %101 : vector<8x128xf32>
    %112 = arith.addf %110, %111 : vector<8x128xf32>
    %113 = math.tanh %112 : vector<8x128xf32>
    %114 = arith.mulf %109, %113 : vector<8x128xf32>
    %c16 = arith.constant 16 : index
    %c0_48 = arith.constant 0 : index
    %115 = vector.load %arg10[%c16, %c0_48] : memref<64x128xf32, #tpu.memory_space<vmem>>, vector<8x128xf32>
    tpu.vector_store %arg10[%c16, %c0_48], %114 {strides = array<i32>} : memref<64x128xf32, #tpu.memory_space<vmem>>, vector<8x128xf32>,
    %c3 = arith.constant 3 : index
    %c0_49 = arith.constant 0 : index
    %c0_50 = arith.constant 0 : index
    %116 = vector.load %arg1[%c3, %c0_49, %c0_50] : memref<8x8x512xf32, #tpu.memory_space<vmem>>, vector<1x8x512xf32>
    %117 = vector.shape_cast %116 : vector<1x8x512xf32> to vector<8x512xf32>
    %118 = arith.truncf %114 : vector<8x128xf32> to vector<8x128xbf16>
    %c0_51 = arith.constant 0 : index
    %c0_52 = arith.constant 0 : index
    %119 = vector.load %arg4[%c0_51, %c0_52] : memref<128x512xbf16, #tpu.memory_space<vmem>>, vector<128x512xbf16>
    %cst_53 = arith.constant dense<0.000000e+00> : vector<8x512xf32>
    %120 = tpu.matmul %118, %119, %cst_53 {dimension_numbers = #tpu.dot_dimension_numbers<[1], [0], [0], [1], [0, 0, 1, 1], [], []>} : vector<8x128xbf16>, vector<128x512xbf16>, vector<8x512xf32> -> vector<8x512xf32>
    %121 = arith.addf %117, %120 : vector<8x512xf32>
    %122 = vector.extract_strided_slice %121 {offsets = [0, 0], sizes = [8, 128], strides = [1, 1]} : vector<8x512xf32> to vector<8x128xf32>
    %cst_54 = arith.constant 5.000000e-01 : f32
    %123 = vector.broadcast %cst_54 : f32 to vector<8x128xf32>
    %124 = arith.mulf %123, %122 : vector<8x128xf32>
    %125 = math.tanh %124 : vector<8x128xf32>
    %cst_55 = arith.constant 5.000000e-01 : f32
    %126 = vector.broadcast %cst_55 : f32 to vector<8x128xf32>
    %127 = arith.mulf %126, %125 : vector<8x128xf32>
    %cst_56 = arith.constant 5.000000e-01 : f32
    %128 = vector.broadcast %cst_56 : f32 to vector<8x128xf32>
    %129 = arith.addf %127, %128 : vector<8x128xf32>
    %130 = vector.extract_strided_slice %121 {offsets = [0, 128], sizes = [8, 128], strides = [1, 1]} : vector<8x512xf32> to vector<8x128xf32>
    %cst_57 = arith.constant 5.000000e-01 : f32
    %131 = vector.broadcast %cst_57 : f32 to vector<8x128xf32>
    %132 = arith.mulf %131, %130 : vector<8x128xf32>
    %133 = math.tanh %132 : vector<8x128xf32>
    %cst_58 = arith.constant 5.000000e-01 : f32
    %134 = vector.broadcast %cst_58 : f32 to vector<8x128xf32>
    %135 = arith.mulf %134, %133 : vector<8x128xf32>
    %cst_59 = arith.constant 5.000000e-01 : f32
    %136 = vector.broadcast %cst_59 : f32 to vector<8x128xf32>
    %137 = arith.addf %135, %136 : vector<8x128xf32>
    %138 = vector.extract_strided_slice %121 {offsets = [0, 256], sizes = [8, 128], strides = [1, 1]} : vector<8x512xf32> to vector<8x128xf32>
    %139 = math.tanh %138 : vector<8x128xf32>
    %140 = vector.extract_strided_slice %121 {offsets = [0, 384], sizes = [8, 128], strides = [1, 1]} : vector<8x512xf32> to vector<8x128xf32>
    %cst_60 = arith.constant 5.000000e-01 : f32
    %141 = vector.broadcast %cst_60 : f32 to vector<8x128xf32>
    %142 = arith.mulf %141, %140 : vector<8x128xf32>
    %143 = math.tanh %142 : vector<8x128xf32>
    %cst_61 = arith.constant 5.000000e-01 : f32
    %144 = vector.broadcast %cst_61 : f32 to vector<8x128xf32>
    %145 = arith.mulf %144, %143 : vector<8x128xf32>
    %cst_62 = arith.constant 5.000000e-01 : f32
    %146 = vector.broadcast %cst_62 : f32 to vector<8x128xf32>
    %147 = arith.addf %145, %146 : vector<8x128xf32>
    %148 = arith.mulf %137, %112 : vector<8x128xf32>
    %149 = arith.mulf %129, %139 : vector<8x128xf32>
    %150 = arith.addf %148, %149 : vector<8x128xf32>
    %151 = math.tanh %150 : vector<8x128xf32>
    %152 = arith.mulf %147, %151 : vector<8x128xf32>
    %c24 = arith.constant 24 : index
    %c0_63 = arith.constant 0 : index
    %153 = vector.load %arg10[%c24, %c0_63] : memref<64x128xf32, #tpu.memory_space<vmem>>, vector<8x128xf32>
    tpu.vector_store %arg10[%c24, %c0_63], %152 {strides = array<i32>} : memref<64x128xf32, #tpu.memory_space<vmem>>, vector<8x128xf32>,
    %c4 = arith.constant 4 : index
    %c0_64 = arith.constant 0 : index
    %c0_65 = arith.constant 0 : index
    %154 = vector.load %arg1[%c4, %c0_64, %c0_65] : memref<8x8x512xf32, #tpu.memory_space<vmem>>, vector<1x8x512xf32>
    %155 = vector.shape_cast %154 : vector<1x8x512xf32> to vector<8x512xf32>
    %156 = arith.truncf %152 : vector<8x128xf32> to vector<8x128xbf16>
    %c0_66 = arith.constant 0 : index
    %c0_67 = arith.constant 0 : index
    %157 = vector.load %arg4[%c0_66, %c0_67] : memref<128x512xbf16, #tpu.memory_space<vmem>>, vector<128x512xbf16>
    %cst_68 = arith.constant dense<0.000000e+00> : vector<8x512xf32>
    %158 = tpu.matmul %156, %157, %cst_68 {dimension_numbers = #tpu.dot_dimension_numbers<[1], [0], [0], [1], [0, 0, 1, 1], [], []>} : vector<8x128xbf16>, vector<128x512xbf16>, vector<8x512xf32> -> vector<8x512xf32>
    %159 = arith.addf %155, %158 : vector<8x512xf32>
    %160 = vector.extract_strided_slice %159 {offsets = [0, 0], sizes = [8, 128], strides = [1, 1]} : vector<8x512xf32> to vector<8x128xf32>
    %cst_69 = arith.constant 5.000000e-01 : f32
    %161 = vector.broadcast %cst_69 : f32 to vector<8x128xf32>
    %162 = arith.mulf %161, %160 : vector<8x128xf32>
    %163 = math.tanh %162 : vector<8x128xf32>
    %cst_70 = arith.constant 5.000000e-01 : f32
    %164 = vector.broadcast %cst_70 : f32 to vector<8x128xf32>
    %165 = arith.mulf %164, %163 : vector<8x128xf32>
    %cst_71 = arith.constant 5.000000e-01 : f32
    %166 = vector.broadcast %cst_71 : f32 to vector<8x128xf32>
    %167 = arith.addf %165, %166 : vector<8x128xf32>
    %168 = vector.extract_strided_slice %159 {offsets = [0, 128], sizes = [8, 128], strides = [1, 1]} : vector<8x512xf32> to vector<8x128xf32>
    %cst_72 = arith.constant 5.000000e-01 : f32
    %169 = vector.broadcast %cst_72 : f32 to vector<8x128xf32>
    %170 = arith.mulf %169, %168 : vector<8x128xf32>
    %171 = math.tanh %170 : vector<8x128xf32>
    %cst_73 = arith.constant 5.000000e-01 : f32
    %172 = vector.broadcast %cst_73 : f32 to vector<8x128xf32>
    %173 = arith.mulf %172, %171 : vector<8x128xf32>
    %cst_74 = arith.constant 5.000000e-01 : f32
    %174 = vector.broadcast %cst_74 : f32 to vector<8x128xf32>
    %175 = arith.addf %173, %174 : vector<8x128xf32>
    %176 = vector.extract_strided_slice %159 {offsets = [0, 256], sizes = [8, 128], strides = [1, 1]} : vector<8x512xf32> to vector<8x128xf32>
    %177 = math.tanh %176 : vector<8x128xf32>
    %178 = vector.extract_strided_slice %159 {offsets = [0, 384], sizes = [8, 128], strides = [1, 1]} : vector<8x512xf32> to vector<8x128xf32>
    %cst_75 = arith.constant 5.000000e-01 : f32
    %179 = vector.broadcast %cst_75 : f32 to vector<8x128xf32>
    %180 = arith.mulf %179, %178 : vector<8x128xf32>
    %181 = math.tanh %180 : vector<8x128xf32>
    %cst_76 = arith.constant 5.000000e-01 : f32
    %182 = vector.broadcast %cst_76 : f32 to vector<8x128xf32>
    %183 = arith.mulf %182, %181 : vector<8x128xf32>
    %cst_77 = arith.constant 5.000000e-01 : f32
    %184 = vector.broadcast %cst_77 : f32 to vector<8x128xf32>
    %185 = arith.addf %183, %184 : vector<8x128xf32>
    %186 = arith.mulf %175, %150 : vector<8x128xf32>
    %187 = arith.mulf %167, %177 : vector<8x128xf32>
    %188 = arith.addf %186, %187 : vector<8x128xf32>
    %189 = math.tanh %188 : vector<8x128xf32>
    %190 = arith.mulf %185, %189 : vector<8x128xf32>
    %c32 = arith.constant 32 : index
    %c0_78 = arith.constant 0 : index
    %191 = vector.load %arg10[%c32, %c0_78] : memref<64x128xf32, #tpu.memory_space<vmem>>, vector<8x128xf32>
    tpu.vector_store %arg10[%c32, %c0_78], %190 {strides = array<i32>} : memref<64x128xf32, #tpu.memory_space<vmem>>, vector<8x128xf32>,
    %c5 = arith.constant 5 : index
    %c0_79 = arith.constant 0 : index
    %c0_80 = arith.constant 0 : index
    %192 = vector.load %arg1[%c5, %c0_79, %c0_80] : memref<8x8x512xf32, #tpu.memory_space<vmem>>, vector<1x8x512xf32>
    %193 = vector.shape_cast %192 : vector<1x8x512xf32> to vector<8x512xf32>
    %194 = arith.truncf %190 : vector<8x128xf32> to vector<8x128xbf16>
    %c0_81 = arith.constant 0 : index
    %c0_82 = arith.constant 0 : index
    %195 = vector.load %arg4[%c0_81, %c0_82] : memref<128x512xbf16, #tpu.memory_space<vmem>>, vector<128x512xbf16>
    %cst_83 = arith.constant dense<0.000000e+00> : vector<8x512xf32>
    %196 = tpu.matmul %194, %195, %cst_83 {dimension_numbers = #tpu.dot_dimension_numbers<[1], [0], [0], [1], [0, 0, 1, 1], [], []>} : vector<8x128xbf16>, vector<128x512xbf16>, vector<8x512xf32> -> vector<8x512xf32>
    %197 = arith.addf %193, %196 : vector<8x512xf32>
    %198 = vector.extract_strided_slice %197 {offsets = [0, 0], sizes = [8, 128], strides = [1, 1]} : vector<8x512xf32> to vector<8x128xf32>
    %cst_84 = arith.constant 5.000000e-01 : f32
    %199 = vector.broadcast %cst_84 : f32 to vector<8x128xf32>
    %200 = arith.mulf %199, %198 : vector<8x128xf32>
    %201 = math.tanh %200 : vector<8x128xf32>
    %cst_85 = arith.constant 5.000000e-01 : f32
    %202 = vector.broadcast %cst_85 : f32 to vector<8x128xf32>
    %203 = arith.mulf %202, %201 : vector<8x128xf32>
    %cst_86 = arith.constant 5.000000e-01 : f32
    %204 = vector.broadcast %cst_86 : f32 to vector<8x128xf32>
    %205 = arith.addf %203, %204 : vector<8x128xf32>
    %206 = vector.extract_strided_slice %197 {offsets = [0, 128], sizes = [8, 128], strides = [1, 1]} : vector<8x512xf32> to vector<8x128xf32>
    %cst_87 = arith.constant 5.000000e-01 : f32
    %207 = vector.broadcast %cst_87 : f32 to vector<8x128xf32>
    %208 = arith.mulf %207, %206 : vector<8x128xf32>
    %209 = math.tanh %208 : vector<8x128xf32>
    %cst_88 = arith.constant 5.000000e-01 : f32
    %210 = vector.broadcast %cst_88 : f32 to vector<8x128xf32>
    %211 = arith.mulf %210, %209 : vector<8x128xf32>
    %cst_89 = arith.constant 5.000000e-01 : f32
    %212 = vector.broadcast %cst_89 : f32 to vector<8x128xf32>
    %213 = arith.addf %211, %212 : vector<8x128xf32>
    %214 = vector.extract_strided_slice %197 {offsets = [0, 256], sizes = [8, 128], strides = [1, 1]} : vector<8x512xf32> to vector<8x128xf32>
    %215 = math.tanh %214 : vector<8x128xf32>
    %216 = vector.extract_strided_slice %197 {offsets = [0, 384], sizes = [8, 128], strides = [1, 1]} : vector<8x512xf32> to vector<8x128xf32>
    %cst_90 = arith.constant 5.000000e-01 : f32
    %217 = vector.broadcast %cst_90 : f32 to vector<8x128xf32>
    %218 = arith.mulf %217, %216 : vector<8x128xf32>
    %219 = math.tanh %218 : vector<8x128xf32>
    %cst_91 = arith.constant 5.000000e-01 : f32
    %220 = vector.broadcast %cst_91 : f32 to vector<8x128xf32>
    %221 = arith.mulf %220, %219 : vector<8x128xf32>
    %cst_92 = arith.constant 5.000000e-01 : f32
    %222 = vector.broadcast %cst_92 : f32 to vector<8x128xf32>
    %223 = arith.addf %221, %222 : vector<8x128xf32>
    %224 = arith.mulf %213, %188 : vector<8x128xf32>
    %225 = arith.mulf %205, %215 : vector<8x128xf32>
    %226 = arith.addf %224, %225 : vector<8x128xf32>
    %227 = math.tanh %226 : vector<8x128xf32>
    %228 = arith.mulf %223, %227 : vector<8x128xf32>
    %c40 = arith.constant 40 : index
    %c0_93 = arith.constant 0 : index
    %229 = vector.load %arg10[%c40, %c0_93] : memref<64x128xf32, #tpu.memory_space<vmem>>, vector<8x128xf32>
    tpu.vector_store %arg10[%c40, %c0_93], %228 {strides = array<i32>} : memref<64x128xf32, #tpu.memory_space<vmem>>, vector<8x128xf32>,
    %c6 = arith.constant 6 : index
    %c0_94 = arith.constant 0 : index
    %c0_95 = arith.constant 0 : index
    %230 = vector.load %arg1[%c6, %c0_94, %c0_95] : memref<8x8x512xf32, #tpu.memory_space<vmem>>, vector<1x8x512xf32>
    %231 = vector.shape_cast %230 : vector<1x8x512xf32> to vector<8x512xf32>
    %232 = arith.truncf %228 : vector<8x128xf32> to vector<8x128xbf16>
    %c0_96 = arith.constant 0 : index
    %c0_97 = arith.constant 0 : index
    %233 = vector.load %arg4[%c0_96, %c0_97] : memref<128x512xbf16, #tpu.memory_space<vmem>>, vector<128x512xbf16>
    %cst_98 = arith.constant dense<0.000000e+00> : vector<8x512xf32>
    %234 = tpu.matmul %232, %233, %cst_98 {dimension_numbers = #tpu.dot_dimension_numbers<[1], [0], [0], [1], [0, 0, 1, 1], [], []>} : vector<8x128xbf16>, vector<128x512xbf16>, vector<8x512xf32> -> vector<8x512xf32>
    %235 = arith.addf %231, %234 : vector<8x512xf32>
    %236 = vector.extract_strided_slice %235 {offsets = [0, 0], sizes = [8, 128], strides = [1, 1]} : vector<8x512xf32> to vector<8x128xf32>
    %cst_99 = arith.constant 5.000000e-01 : f32
    %237 = vector.broadcast %cst_99 : f32 to vector<8x128xf32>
    %238 = arith.mulf %237, %236 : vector<8x128xf32>
    %239 = math.tanh %238 : vector<8x128xf32>
    %cst_100 = arith.constant 5.000000e-01 : f32
    %240 = vector.broadcast %cst_100 : f32 to vector<8x128xf32>
    %241 = arith.mulf %240, %239 : vector<8x128xf32>
    %cst_101 = arith.constant 5.000000e-01 : f32
    %242 = vector.broadcast %cst_101 : f32 to vector<8x128xf32>
    %243 = arith.addf %241, %242 : vector<8x128xf32>
    %244 = vector.extract_strided_slice %235 {offsets = [0, 128], sizes = [8, 128], strides = [1, 1]} : vector<8x512xf32> to vector<8x128xf32>
    %cst_102 = arith.constant 5.000000e-01 : f32
    %245 = vector.broadcast %cst_102 : f32 to vector<8x128xf32>
    %246 = arith.mulf %245, %244 : vector<8x128xf32>
    %247 = math.tanh %246 : vector<8x128xf32>
    %cst_103 = arith.constant 5.000000e-01 : f32
    %248 = vector.broadcast %cst_103 : f32 to vector<8x128xf32>
    %249 = arith.mulf %248, %247 : vector<8x128xf32>
    %cst_104 = arith.constant 5.000000e-01 : f32
    %250 = vector.broadcast %cst_104 : f32 to vector<8x128xf32>
    %251 = arith.addf %249, %250 : vector<8x128xf32>
    %252 = vector.extract_strided_slice %235 {offsets = [0, 256], sizes = [8, 128], strides = [1, 1]} : vector<8x512xf32> to vector<8x128xf32>
    %253 = math.tanh %252 : vector<8x128xf32>
    %254 = vector.extract_strided_slice %235 {offsets = [0, 384], sizes = [8, 128], strides = [1, 1]} : vector<8x512xf32> to vector<8x128xf32>
    %cst_105 = arith.constant 5.000000e-01 : f32
    %255 = vector.broadcast %cst_105 : f32 to vector<8x128xf32>
    %256 = arith.mulf %255, %254 : vector<8x128xf32>
    %257 = math.tanh %256 : vector<8x128xf32>
    %cst_106 = arith.constant 5.000000e-01 : f32
    %258 = vector.broadcast %cst_106 : f32 to vector<8x128xf32>
    %259 = arith.mulf %258, %257 : vector<8x128xf32>
    %cst_107 = arith.constant 5.000000e-01 : f32
    %260 = vector.broadcast %cst_107 : f32 to vector<8x128xf32>
    %261 = arith.addf %259, %260 : vector<8x128xf32>
    %262 = arith.mulf %251, %226 : vector<8x128xf32>
    %263 = arith.mulf %243, %253 : vector<8x128xf32>
    %264 = arith.addf %262, %263 : vector<8x128xf32>
    %265 = math.tanh %264 : vector<8x128xf32>
    %266 = arith.mulf %261, %265 : vector<8x128xf32>
    %c48 = arith.constant 48 : index
    %c0_108 = arith.constant 0 : index
    %267 = vector.load %arg10[%c48, %c0_108] : memref<64x128xf32, #tpu.memory_space<vmem>>, vector<8x128xf32>
    tpu.vector_store %arg10[%c48, %c0_108], %266 {strides = array<i32>} : memref<64x128xf32, #tpu.memory_space<vmem>>, vector<8x128xf32>,
    %c7 = arith.constant 7 : index
    %c0_109 = arith.constant 0 : index
    %c0_110 = arith.constant 0 : index
    %268 = vector.load %arg1[%c7, %c0_109, %c0_110] : memref<8x8x512xf32, #tpu.memory_space<vmem>>, vector<1x8x512xf32>
    %269 = vector.shape_cast %268 : vector<1x8x512xf32> to vector<8x512xf32>
    %270 = arith.truncf %266 : vector<8x128xf32> to vector<8x128xbf16>
    %c0_111 = arith.constant 0 : index
    %c0_112 = arith.constant 0 : index
    %271 = vector.load %arg4[%c0_111, %c0_112] : memref<128x512xbf16, #tpu.memory_space<vmem>>, vector<128x512xbf16>
    %cst_113 = arith.constant dense<0.000000e+00> : vector<8x512xf32>
    %272 = tpu.matmul %270, %271, %cst_113 {dimension_numbers = #tpu.dot_dimension_numbers<[1], [0], [0], [1], [0, 0, 1, 1], [], []>} : vector<8x128xbf16>, vector<128x512xbf16>, vector<8x512xf32> -> vector<8x512xf32>
    %273 = arith.addf %269, %272 : vector<8x512xf32>
    %274 = vector.extract_strided_slice %273 {offsets = [0, 0], sizes = [8, 128], strides = [1, 1]} : vector<8x512xf32> to vector<8x128xf32>
    %cst_114 = arith.constant 5.000000e-01 : f32
    %275 = vector.broadcast %cst_114 : f32 to vector<8x128xf32>
    %276 = arith.mulf %275, %274 : vector<8x128xf32>
    %277 = math.tanh %276 : vector<8x128xf32>
    %cst_115 = arith.constant 5.000000e-01 : f32
    %278 = vector.broadcast %cst_115 : f32 to vector<8x128xf32>
    %279 = arith.mulf %278, %277 : vector<8x128xf32>
    %cst_116 = arith.constant 5.000000e-01 : f32
    %280 = vector.broadcast %cst_116 : f32 to vector<8x128xf32>
    %281 = arith.addf %279, %280 : vector<8x128xf32>
    %282 = vector.extract_strided_slice %273 {offsets = [0, 128], sizes = [8, 128], strides = [1, 1]} : vector<8x512xf32> to vector<8x128xf32>
    %cst_117 = arith.constant 5.000000e-01 : f32
    %283 = vector.broadcast %cst_117 : f32 to vector<8x128xf32>
    %284 = arith.mulf %283, %282 : vector<8x128xf32>
    %285 = math.tanh %284 : vector<8x128xf32>
    %cst_118 = arith.constant 5.000000e-01 : f32
    %286 = vector.broadcast %cst_118 : f32 to vector<8x128xf32>
    %287 = arith.mulf %286, %285 : vector<8x128xf32>
    %cst_119 = arith.constant 5.000000e-01 : f32
    %288 = vector.broadcast %cst_119 : f32 to vector<8x128xf32>
    %289 = arith.addf %287, %288 : vector<8x128xf32>
    %290 = vector.extract_strided_slice %273 {offsets = [0, 256], sizes = [8, 128], strides = [1, 1]} : vector<8x512xf32> to vector<8x128xf32>
    %291 = math.tanh %290 : vector<8x128xf32>
    %292 = vector.extract_strided_slice %273 {offsets = [0, 384], sizes = [8, 128], strides = [1, 1]} : vector<8x512xf32> to vector<8x128xf32>
    %cst_120 = arith.constant 5.000000e-01 : f32
    %293 = vector.broadcast %cst_120 : f32 to vector<8x128xf32>
    %294 = arith.mulf %293, %292 : vector<8x128xf32>
    %295 = math.tanh %294 : vector<8x128xf32>
    %cst_121 = arith.constant 5.000000e-01 : f32
    %296 = vector.broadcast %cst_121 : f32 to vector<8x128xf32>
    %297 = arith.mulf %296, %295 : vector<8x128xf32>
    %cst_122 = arith.constant 5.000000e-01 : f32
    %298 = vector.broadcast %cst_122 : f32 to vector<8x128xf32>
    %299 = arith.addf %297, %298 : vector<8x128xf32>
    %300 = arith.mulf %289, %264 : vector<8x128xf32>
    %301 = arith.mulf %281, %291 : vector<8x128xf32>
    %302 = arith.addf %300, %301 : vector<8x128xf32>
    %303 = math.tanh %302 : vector<8x128xf32>
    %304 = arith.mulf %299, %303 : vector<8x128xf32>
    %c56 = arith.constant 56 : index
    %c0_123 = arith.constant 0 : index
    %305 = vector.load %arg10[%c56, %c0_123] : memref<64x128xf32, #tpu.memory_space<vmem>>, vector<8x128xf32>
    tpu.vector_store %arg10[%c56, %c0_123], %304 {strides = array<i32>} : memref<64x128xf32, #tpu.memory_space<vmem>>, vector<8x128xf32>,
    %c0_124 = arith.constant 0 : index
    %c0_125 = arith.constant 0 : index
    %306 = vector.load %arg8[%c0_124, %c0_125] : memref<8x128xf32, #tpu.memory_space<vmem>>, vector<8x128xf32>
    tpu.vector_store %arg8[%c0_124, %c0_125], %304 {strides = array<i32>} : memref<8x128xf32, #tpu.memory_space<vmem>>, vector<8x128xf32>,
    %c0_126 = arith.constant 0 : index
    %c0_127 = arith.constant 0 : index
    %307 = vector.load %arg9[%c0_126, %c0_127] : memref<8x128xf32, #tpu.memory_space<vmem>>, vector<8x128xf32>
    tpu.vector_store %arg9[%c0_126, %c0_127], %302 {strides = array<i32>} : memref<8x128xf32, #tpu.memory_space<vmem>>, vector<8x128xf32>,
    %c0_128 = arith.constant 0 : index
    %c0_129 = arith.constant 0 : index
    %308 = vector.load %arg10[%c0_128, %c0_129] : memref<64x128xf32, #tpu.memory_space<vmem>>, vector<64x128xf32>
    %309 = arith.truncf %308 : vector<64x128xf32> to vector<64x128xbf16>
    %c0_130 = arith.constant 0 : index
    %c0_131 = arith.constant 0 : index
    %310 = vector.load %arg5[%c0_130, %c0_131] : memref<128x128xbf16, #tpu.memory_space<vmem>>, vector<128x128xbf16>
    %cst_132 = arith.constant dense<0.000000e+00> : vector<64x128xf32>
    %311 = tpu.matmul %309, %310, %cst_132 {dimension_numbers = #tpu.dot_dimension_numbers<[1], [0], [0], [1], [0, 0, 1, 1], [], []>} : vector<64x128xbf16>, vector<128x128xbf16>, vector<64x128xf32> -> vector<64x128xf32>
    %c0_133 = arith.constant 0 : index
    %c0_134 = arith.constant 0 : index
    %312 = vector.load %arg6[%c0_133, %c0_134] : memref<1x128xf32, #tpu.memory_space<vmem>>, vector<1x128xf32>
    %313 = vector.broadcast %312 : vector<1x128xf32> to vector<64x128xf32>
    %314 = arith.addf %311, %313 : vector<64x128xf32>
    %315 = vector.shape_cast %314 : vector<64x128xf32> to vector<8x8x128xf32>
    %c0_135 = arith.constant 0 : index
    %c0_136 = arith.constant 0 : index
    %c0_137 = arith.constant 0 : index
    %316 = vector.load %arg7[%c0_135, %c0_136, %c0_137] : memref<8x8x128xf32, #tpu.memory_space<vmem>>, vector<8x8x128xf32>
    tpu.vector_store %arg7[%c0_135, %c0_136, %c0_137], %315 {strides = array<i32>} : memref<8x8x128xf32, #tpu.memory_space<vmem>>, vector<8x8x128xf32>,
    return
  }
  func.func @transform_0(%arg0: i32) -> (i32, i32, i32) {
    %c0_i32 = arith.constant 0 : i32
    %c0_i32_0 = arith.constant 0 : i32
    %c0_i32_1 = arith.constant 0 : i32
    return %c0_i32, %arg0, %c0_i32_0 : i32, i32, i32
  }
  func.func @transform_1(%arg0: i32) -> (i32, i32) {
    %c0_i32 = arith.constant 0 : i32
    %c0_i32_0 = arith.constant 0 : i32
    return %arg0, %c0_i32 : i32, i32
  }
  func.func @transform_2(%arg0: i32) -> (i32, i32) {
    %c0_i32 = arith.constant 0 : i32
    %c0_i32_0 = arith.constant 0 : i32
    return %arg0, %c0_i32 : i32, i32
  }
  func.func @transform_3(%arg0: i32) -> (i32, i32) {
    %c0_i32 = arith.constant 0 : i32
    %c0_i32_0 = arith.constant 0 : i32
    %c0_i32_1 = arith.constant 0 : i32
    return %c0_i32, %c0_i32_0 : i32, i32
  }
  func.func @transform_4(%arg0: i32) -> (i32, i32) {
    %c0_i32 = arith.constant 0 : i32
    %c0_i32_0 = arith.constant 0 : i32
    %c0_i32_1 = arith.constant 0 : i32
    return %c0_i32, %c0_i32_0 : i32, i32
  }
  func.func @transform_5(%arg0: i32) -> (i32, i32) {
    %c0_i32 = arith.constant 0 : i32
    %c0_i32_0 = arith.constant 0 : i32
    %c0_i32_1 = arith.constant 0 : i32
    return %c0_i32, %c0_i32_0 : i32, i32
  }
  func.func @transform_6(%arg0: i32) -> (i32, i32, i32) {
    %c0_i32 = arith.constant 0 : i32
    %c0_i32_0 = arith.constant 0 : i32
    %c0_i32_1 = arith.constant 0 : i32
    return %c0_i32, %arg0, %c0_i32_0 : i32, i32, i32
  }
  func.func @transform_7(%arg0: i32) -> (i32, i32) {
    %c0_i32 = arith.constant 0 : i32
    %c0_i32_0 = arith.constant 0 : i32
    return %arg0, %c0_i32 : i32, i32
  }
  func.func @transform_8(%arg0: i32) -> (i32, i32) {
    %c0_i32 = arith.constant 0 : i32
    %c0_i32_0 = arith.constant 0 : i32
    return %arg0, %c0_i32 : i32, i32
  }
}

</mosaic_0001>

<bundles_post_ra>
// kernel: tpu_custom_call.1
= control target key start
LH: loop header
LB: loop body
LE: loop exit
PB: predicated region body
PF: predicated region fallthrough
CT: control target
= control target key end

     0   :  { %14 = vsyncpa [#allocation4], 0  ;;  %s3946_s0 = inlined_call_operand.hbm [shape: f32[8,8,512], index: 0, kind: input, shape index: {}]   ;;  %s3947_s1 = inlined_call_operand.hbm [shape: f32[8,128], index: 1, kind: input, shape index: {}]   ;;  %s3948_s2 = inlined_call_operand.hbm [shape: f32[8,128], index: 2, kind: input, shape index: {}]   ;;  %s3949_s3 = inlined_call_operand.hbm [shape: bf16[128,512], index: 3, kind: input, shape index: {}]   ;;  %s3950_s4 = inlined_call_operand.hbm [shape: bf16[128,128], index: 4, kind: input, shape index: {}]   ;;  %s3951_s5 = inlined_call_operand.vmem [shape: f32[1,128], index: 5, kind: input, shape index: {}]   ;;  %s3952_s6 = inlined_call_operand.hbm [shape: f32[8,8,128], index: 6, kind: output, shape index: {0}]   ;;  %s3953_s7 = inlined_call_operand.hbm [shape: f32[8,128], index: 7, kind: output, shape index: {1}]   ;;  %s3954_s8 = inlined_call_operand.hbm [shape: f32[8,128], index: 8, kind: output, shape index: {2}]  }
   0x1   :  { %15 = vsyncpa [#allocation7], 0 }
   0x2   :  { %16 = vsyncpa [#allocation10], 0 }
   0x3   :  { %17 = vsyncpa [#allocation5], 0 }
   0x4   :  { %18 = vsyncpa [#allocation14], 0  ;;  %s3394_s27 = smov [#allocation6]   ;;  %s3395_s29 = smov [#allocation9]  }
   0x5   :  { %s37_s28 = sshll.u32 %s3394_s27, 4  ;;  %s56_s30 = sshll.u32 %s3395_s29, 4  ;;  %s38_s28 = int_to_ptr.vmem [resolvable:$true] %s37_s28  ;;  %s57_s30 = int_to_ptr.vmem [resolvable:$true] %s56_s30 }
   0x6   :  { %s3232_s9 = scalar_lea.vmem %s38_s28, 128  ;;  %p3237_p1 = scmp.lt.s32.totalorder %s38_s28, %s38_s28 }
   0x7   :  { %p3233_p0 = scmp.ne.s32.totalorder %s38_s28, %s3232_s9  ;;  %p3238_p2 = scmp.lt.s32.totalorder %s3232_s9, %s3232_s9 }
   0x9   :  { %p3239_p3 = por %p3238_p2, %p3237_p1 }
   0xb   :  { %p3240_p4 = pnand %p3239_p3, %p3233_p0 }
   0xd   :  { %3243 = shalt.err (!%p3240_p4)
}
   0xe   :  { %40 = dma.hbm_to_vmem [thread:$0]  %s3947_s1, 128, %s38_s28, [#allocation7]  }
   0xf   :  { %s3252_s12 = scalar_lea.vmem %s57_s30, 4096  ;;  %p3257_p6 = scmp.lt.s32.totalorder %s57_s30, %s57_s30 }
  0x10   :  { %p3253_p5 = scmp.ne.s32.totalorder %s57_s30, %s3252_s12  ;;  %p3258_p7 = scmp.lt.s32.totalorder %s3252_s12, %s3252_s12 }
  0x12   :  { %p3259_p8 = por %p3258_p7, %p3257_p6 }
  0x14   :  { %p3260_p9 = pnand %p3259_p8, %p3253_p5 }
  0x16   :  { %3263 = shalt.err (!%p3260_p9)
}
  0x17   :  { %s3396_s13 = smov 256   ;;  %s3397_s14 = smov 16  }
  0x18   :  { %62 = dma.hbm_to_vmem [thread:$0]  %s3949_s3, 4096, %s57_s30, [#allocation10], %s3396_s13, %s3396_s13, %s3397_s14  }
  0x19   :  { %s3398_s17 = smov [#allocation3]  }
  0x1a   :  { %s24_s18 = sshll.u32 %s3398_s17, 4  ;;  %s25_s18 = int_to_ptr.vmem [resolvable:$true] %s24_s18 }
  0x1b   :  { %s3272_s19 = scalar_lea.vmem %s25_s18, 4096  ;;  %p3277_p11 = scmp.lt.s32.totalorder %s25_s18, %s25_s18 }
  0x1c   :  { %p3273_p10 = scmp.ne.s32.totalorder %s25_s18, %s3272_s19  ;;  %p3278_p12 = scmp.lt.s32.totalorder %s3272_s19, %s3272_s19 }
  0x1e   :  { %p3279_p13 = por %p3278_p12, %p3277_p11 }
  0x20   :  { %p3280_p0 = pnand %p3279_p13, %p3273_p10 }
  0x22   :  { %3283 = shalt.err (!%p3280_p0)
}
  0x23   :  { %s3399_s1 = smov 512   ;;  %s3400_s20 = smov 32  }
  0x24   :  { %30 = dma.hbm_to_vmem [thread:$0]  %s3946_s0, 4096, %s25_s18, [#allocation4], %s3399_s1, %s3399_s1, %s3400_s20  }
  0x25   :  { %s3401_s23 = smov [#allocation8]   ;;  %s3402_s3 = smov [#allocation11]  }
  0x26   :  { %s47_s24 = sshll.u32 %s3401_s23, 4  ;;  %s68_s25 = sshll.u32 %s3402_s3, 4  ;;  %s48_s24 = int_to_ptr.vmem [resolvable:$true] %s47_s24  ;;  %s69_s25 = int_to_ptr.vmem [resolvable:$true] %s68_s25 }
  0x27   :  { %s3292_s26 = scalar_lea.vmem %s48_s24, 128  ;;  %p3297_p2 = scmp.lt.s32.totalorder %s48_s24, %s48_s24 }
  0x28   :  { %p3293_p1 = scmp.ne.s32.totalorder %s48_s24, %s3292_s26  ;;  %p3298_p3 = scmp.lt.s32.totalorder %s3292_s26, %s3292_s26 }
  0x2a   :  { %p3299_p4 = por %p3298_p3, %p3297_p2 }
  0x2c   :  { %p3300_p5 = pnand %p3299_p4, %p3293_p1 }
  0x2e   :  { %3303 = shalt.err (!%p3300_p5)
}
  0x2f   :  { %50 = dma.hbm_to_vmem [thread:$0]  %s3948_s2, 128, %s48_s24, [#allocation7]  }
  0x30   :  { %s3312_s29 = scalar_lea.vmem %s69_s25, 1024  ;;  %p3317_p7 = scmp.lt.s32.totalorder %s69_s25, %s69_s25 }
  0x31   :  { %p3313_p6 = scmp.ne.s32.totalorder %s69_s25, %s3312_s29  ;;  %p3318_p8 = scmp.lt.s32.totalorder %s3312_s29, %s3312_s29 }
  0x33   :  { %p3319_p9 = por %p3318_p8, %p3317_p7 }
  0x35   :  { %p3320_p10 = pnand %p3319_p9, %p3313_p6 }
  0x37   :  { %3323 = shalt.err (!%p3320_p10)
}
  0x38   :  { %s3403_s0 = smov 64   ;;  %s3404_s30 = smov 4  }
  0x39   :  { %74 = dma.hbm_to_vmem [thread:$0]  %s3950_s4, 1024, %s69_s25, [#allocation10], %s3403_s0, %s3403_s0, %s3404_s30  }
  0x3a   :  { %3384 = dma.done.wait [#allocation4], 4096  }
  0x3b   :  { %3385 = vsyncadd [#allocation4], 4294963200 }
  0x3c   :  { %3386 = dma.done.wait [#allocation7], 256  }
  0x3d   :  { %3387 = vsyncadd [#allocation7], 4294967040 }
  0x3e   :  { %3388 = dma.done.wait [#allocation10], 5120  }
  0x3f   :  { %3389 = vsyncadd [#allocation10], 4294962176  ;;  %v3405_v0 = vmov 0   ;;  %v3473_v1 = vld [vmem:[#allocation9 + $0xe4] ss:$16 sps:$4 sm:$0xff]   ;;  %v96_v39 = vld [vmem:[#allocation3 + $0x8] sm:$0xff] }
  0x40   :  { %324 = vmatprep.mubr.bf16.mxu1 %v3405_v0  ;;  %627 = vmatprep.mubr.bf16.mxu0 %v3405_v0  ;;  %v3475_v2 = vld [vmem:[#allocation9 + $0xe0] ss:$16 sps:$4 sm:$0xff]   ;;  %v3478_v3 = vld [vmem:[#allocation9 + $0xc4] ss:$16 sps:$4 sm:$0xff]   ;;  %v3531_v18 = vld [vmem:[#allocation9 + $0xec] ss:$16 sps:$4 sm:$0xff]  }
  0x41   :  { %292 = vmatprep.subr.bf16.mxu1 %v3473_v1  ;;  %595 = vmatprep.subr.bf16.mxu0 %v3473_v1  ;;  %v3482_v4 = vld [vmem:[#allocation9 + $0xc0] ss:$16 sps:$4 sm:$0xff]   ;;  %v3486_v5 = vld [vmem:[#allocation9 + $0xa4] ss:$16 sps:$4 sm:$0xff]   ;;  %v3537_v19 = vld [vmem:[#allocation9 + $0xe8] ss:$16 sps:$4 sm:$0xff]  }
  0x42   :  { %293 = vmatpush1.bf16.msra.mxu1 %v3475_v2  ;;  %596 = vmatpush1.bf16.msra.mxu0 %v3475_v2  ;;  %v3490_v6 = vld [vmem:[#allocation9 + $0xa0] ss:$16 sps:$4 sm:$0xff]   ;;  %v3494_v7 = vld [vmem:[#allocation9 + $0x84] ss:$16 sps:$4 sm:$0xff]   ;;  %v3539_v21 = vld [vmem:[#allocation9 + $0xcc] ss:$16 sps:$4 sm:$0xff]  }
  0x43   :  { %294 = vmatprep.subr.bf16.mxu1 %v3478_v3  ;;  %597 = vmatprep.subr.bf16.mxu0 %v3478_v3  ;;  %v3498_v8 = vld [vmem:[#allocation9 + $0x80] ss:$16 sps:$4 sm:$0xff]   ;;  %v3502_v9 = vld [vmem:[#allocation9 + $0x64] ss:$16 sps:$4 sm:$0xff]   ;;  %v3545_v22 = vld [vmem:[#allocation9 + $0xc8] ss:$16 sps:$4 sm:$0xff]  }
  0x44   :  { %v3506_v10 = vld [vmem:[#allocation9 + $0x60] ss:$16 sps:$4 sm:$0xff]   ;;  %v3510_v11 = vld [vmem:[#allocation9 + $0x44] ss:$16 sps:$4 sm:$0xff]   ;;  %v3547_v23 = vld [vmem:[#allocation9 + $0xac] ss:$16 sps:$4 sm:$0xff]  }
  0x45   :  { %v3514_v12 = vld [vmem:[#allocation9 + $0x40] ss:$16 sps:$4 sm:$0xff]   ;;  %v3518_v13 = vld [vmem:[#allocation9 + $0x24] ss:$16 sps:$4 sm:$0xff]   ;;  %v3553_v24 = vld [vmem:[#allocation9 + $0xa8] ss:$16 sps:$4 sm:$0xff]  }
  0x46   :  { %295 = vmatpush1.bf16.msra.mxu1 %v3482_v4  ;;  %598 = vmatpush1.bf16.msra.mxu0 %v3482_v4  ;;  %v3521_v14 = vld [vmem:[#allocation9 + $0x20] ss:$16 sps:$4 sm:$0xff]   ;;  %v3523_v15 = vld [vmem:[#allocation9 + $0x4] ss:$16 sps:$4 sm:$0xff]   ;;  %v3556_v25 = vld [vmem:[#allocation9 + $0x8c] ss:$16 sps:$4 sm:$0xff]  }
  0x47   :  { %296 = vmatprep.subr.bf16.mxu1 %v3486_v5  ;;  %599 = vmatprep.subr.bf16.mxu0 %v3486_v5  ;;  %v3529_v16 = vld [vmem:[#allocation9] ss:$16 sps:$4 sm:$0xff]   ;;  %v3559_v26 = vld [vmem:[#allocation9 + $0x88] ss:$16 sps:$4 sm:$0xff]   ;;  %v3562_v27 = vld [vmem:[#allocation9 + $0x6c] ss:$16 sps:$4 sm:$0xff]  }
  0x48   :  { %v93_v17 = vld [vmem:[#allocation6] sm:$0xff]  ;;  %v3565_v28 = vld [vmem:[#allocation9 + $0x68] ss:$16 sps:$4 sm:$0xff]   ;;  %v3568_v29 = vld [vmem:[#allocation9 + $0x4c] ss:$16 sps:$4 sm:$0xff]  }
  0x49   :  { %v99_v20 = vpack.c.bf16 %v93_v17, %v93_v17  ;;  %v3571_v30 = vld [vmem:[#allocation9 + $0x48] ss:$16 sps:$4 sm:$0xff]   ;;  %v3574_v31 = vld [vmem:[#allocation9 + $0x2c] ss:$16 sps:$4 sm:$0xff]   ;;  %v95_v40 = vld [vmem:[#allocation3] sm:$0xff] }
  0x4a   :  { %297 = vmatpush1.bf16.msra.mxu1 %v3490_v6  ;;  %600 = vmatpush1.bf16.msra.mxu0 %v3490_v6  ;;  %v3577_v32 = vld [vmem:[#allocation9 + $0x28] ss:$16 sps:$4 sm:$0xff]   ;;  %v3580_v33 = vld [vmem:[#allocation9 + $0xc] ss:$16 sps:$4 sm:$0xff]   ;;  %v97_v45 = vld [vmem:[#allocation3 + $0x10] sm:$0xff] }
  0x4b   :  { %298 = vmatprep.subr.bf16.mxu1 %v3494_v7  ;;  %601 = vmatprep.subr.bf16.mxu0 %v3494_v7  ;;  %v3583_v34 = vld [vmem:[#allocation9 + $0x8] ss:$16 sps:$4 sm:$0xff]  }
  0x4c   :  { %v98_v48 = vld [vmem:[#allocation3 + $0x18] sm:$0xff]  ;;  %v94_v59 = vld [vmem:[#allocation8] sm:$0xff] }
  0x4e   :  { %299 = vmatpush1.bf16.msra.mxu1 %v3498_v8  ;;  %602 = vmatpush1.bf16.msra.mxu0 %v3498_v8 }
  0x4f   :  { %300 = vmatprep.subr.bf16.mxu1 %v3502_v9  ;;  %603 = vmatprep.subr.bf16.mxu0 %v3502_v9 }
  0x52   :  { %301 = vmatpush1.bf16.msra.mxu1 %v3506_v10  ;;  %604 = vmatpush1.bf16.msra.mxu0 %v3506_v10 }
  0x53   :  { %302 = vmatprep.subr.bf16.mxu1 %v3510_v11  ;;  %605 = vmatprep.subr.bf16.mxu0 %v3510_v11 }
  0x56   :  { %303 = vmatpush1.bf16.msra.mxu1 %v3514_v12  ;;  %606 = vmatpush1.bf16.msra.mxu0 %v3514_v12 }
  0x57   :  { %304 = vmatprep.subr.bf16.mxu1 %v3518_v13  ;;  %607 = vmatprep.subr.bf16.mxu0 %v3518_v13 }
  0x5a   :  { %305 = vmatpush1.bf16.msra.mxu1 %v3521_v14  ;;  %608 = vmatpush1.bf16.msra.mxu0 %v3521_v14 }
  0x5b   :  { %306 = vmatprep.subr.bf16.mxu1 %v3523_v15  ;;  %609 = vmatprep.subr.bf16.mxu0 %v3523_v15 }
  0x5e   :  { %307 = vmatpush1.bf16.msra.mxu1 %v3529_v16  ;;  %610 = vmatpush1.bf16.msra.mxu0 %v3529_v16 }
  0x5f   :  { %333 = vmatprep.subr.bf16.mxu1 %v3531_v18  ;;  %898 = vmatprep.subr.bf16.mxu0 %v3473_v1 }
  0x61   :  { %325 = vmatmul.mubr.bf16.vlgmr.msra.gmra.mxu1 %v99_v20 }
  0x62   :  { %334 = vmatpush1.bf16.msra.mxu1 %v3537_v19  ;;  %365 = vmatprep.mubr.bf16.mxu1 %v3405_v0 }
  0x63   :  { %335 = vmatprep.subr.bf16.mxu1 %v3539_v21 }
  0x66   :  { %336 = vmatpush1.bf16.msra.mxu1 %v3545_v22 }
  0x67   :  { %337 = vmatprep.subr.bf16.mxu1 %v3547_v23 }
  0x6a   :  { %338 = vmatpush1.bf16.msra.mxu1 %v3553_v24 }
  0x6b   :  { %339 = vmatprep.subr.bf16.mxu1 %v3556_v25 }
  0x6e   :  { %340 = vmatpush1.bf16.msra.mxu1 %v3559_v26 }
  0x6f   :  { %341 = vmatprep.subr.bf16.mxu1 %v3562_v27 }
  0x72   :  { %342 = vmatpush1.bf16.msra.mxu1 %v3565_v28 }
  0x73   :  { %343 = vmatprep.subr.bf16.mxu1 %v3568_v29 }
  0x76   :  { %344 = vmatpush1.bf16.msra.mxu1 %v3571_v30 }
  0x77   :  { %345 = vmatprep.subr.bf16.mxu1 %v3574_v31 }
  0x7a   :  { %346 = vmatpush1.bf16.msra.mxu1 %v3577_v32 }
  0x7b   :  { %347 = vmatprep.subr.bf16.mxu1 %v3580_v33 }
  0x7e   :  { %348 = vmatpush1.bf16.msra.mxu1 %v3583_v34 }
  0x7f   :  { %636 = vmatprep.subr.bf16.mxu1 %v3531_v18 }
  0x81   :  { %366 = vmatmul.mubr.bf16.vlgmr.msra.gmra.mxu1 %v99_v20 }
  0x82   :  { %637 = vmatpush1.bf16.msra.mxu1 %v3537_v19  ;;  %668 = vmatprep.mubr.bf16.mxu1 %v3405_v0 }
  0x83   :  { %638 = vmatprep.subr.bf16.mxu1 %v3539_v21 }
  0x86   :  { %639 = vmatpush1.bf16.msra.mxu1 %v3545_v22 }
  0x87   :  { %640 = vmatprep.subr.bf16.mxu1 %v3547_v23 }
  0x8a   :  { %641 = vmatpush1.bf16.msra.mxu1 %v3553_v24 }
  0x8b   :  { %642 = vmatprep.subr.bf16.mxu1 %v3556_v25 }
  0x8e   :  { %643 = vmatpush1.bf16.msra.mxu1 %v3559_v26 }
  0x8f   :  { %644 = vmatprep.subr.bf16.mxu1 %v3562_v27 }
  0x92   :  { %645 = vmatpush1.bf16.msra.mxu1 %v3565_v28 }
  0x93   :  { %646 = vmatprep.subr.bf16.mxu1 %v3568_v29 }
  0x96   :  { %647 = vmatpush1.bf16.msra.mxu1 %v3571_v30 }
  0x97   :  { %648 = vmatprep.subr.bf16.mxu1 %v3574_v31 }
  0x9a   :  { %649 = vmatpush1.bf16.msra.mxu1 %v3577_v32 }
  0x9b   :  { %650 = vmatprep.subr.bf16.mxu1 %v3580_v33 }
  0x9e   :  { %651 = vmatpush1.bf16.msra.mxu1 %v3583_v34 }
  0x9f   :  { %939 = vmatprep.subr.bf16.mxu1 %v3531_v18 }
 0x121   :  { %v326_v35 = vpop.f32.mrf.mxu1 }
 0x122   :  { %v374_v42 = vadd.f32 %v326_v35, %v95_v40  ;;  %v398_v40 = vld [vmem:[#allocation3 + $0x20] sm:$0xff] }
 0x123   :  { %v328_v36 = vpop.f32.mrf.mxu1 }
 0x124   :  { %v375_v41 = vadd.f32 %v328_v36, %v96_v39  ;;  %v378_v44 = vmul.f32 0.5, %v374_v42 }
 0x125   :  { %v330_v37 = vpop.f32.mrf.mxu1 }
 0x126   :  { %v382_v43 = vmul.f32 0.5, %v375_v41 }
 0x127   :  { %v331_v38 = vpop.f32.mrf.mxu1 }
 0x128   :  { %3144 = vtanh.f32 %v382_v43  ;;  %v399_v43 = vld [vmem:[#allocation3 + $0x28] sm:$0xff] }
 0x129   :  { %3146 = vtanh.f32 %v378_v44 }
 0x135   :  { %v3145_v52 = vpop.eup %3144 }
 0x136   :  { %v3147_v54 = vpop.eup %3146  ;;  %v384_v55 = vmul.f32 0.5, %v3145_v52 }
 0x137   :  { %v380_v57 = vmul.f32 0.5, %v3147_v54 }
 0x138   :  { %v385_v58 = vadd.f32 0.5, %v384_v55 }
 0x139   :  { %v381_v60 = vadd.f32 0.5, %v380_v57 }
 0x13a   :  { %v391_v62 = vmul.f32 %v385_v58, %v94_v59 }
 0x141   :  { %v367_v46 = vpop.f32.mrf.mxu1 }
 0x142   :  { %v376_v47 = vadd.f32 %v367_v46, %v97_v45 }
 0x143   :  { %v369_v49 = vpop.f32.mrf.mxu1 }
 0x144   :  { %3148 = vtanh.f32 %v376_v47  ;;  %v377_v51 = vadd.f32 %v369_v49, %v98_v48  ;;  %v400_v49 = vld [vmem:[#allocation3 + $0x30] sm:$0xff] }
 0x145   :  { %v371_v50 = vpop.f32.mrf.mxu1 }
 0x146   :  { %v387_v56 = vmul.f32 0.5, %v377_v51 }
 0x147   :  { %v372_v53 = vpop.f32.mrf.mxu1 }
 0x148   :  { %3150 = vtanh.f32 %v387_v56 }
 0x151   :  { %v3149_v61 = vpop.eup %3148 }
 0x152   :  { %v392_v63 = vmul.f32 %v3149_v61, %v381_v60 }
 0x154   :  { %v3605_v17 = vadd.f32 %v392_v63, %v391_v62 }
 0x155   :  { %v3151_v20 = vpop.eup %3150 }
 0x156   :  { %3152 = vtanh.f32 %v3605_v17  ;;  %v389_v35 = vmul.f32 0.5, %v3151_v20 }
 0x158   :  { %v390_v36 = vadd.f32 0.5, %v389_v35 }
 0x163   :  { %v3153_v37 = vpop.eup %3152 }
 0x164   :  { %v3608_v38 = vmul.f32 %v3153_v37, %v390_v36 }
 0x166   :  { %v402_v39 = vpack.c.bf16 %v3608_v38, %v3608_v38 }
 0x168   :  { %628 = vmatmul.mubr.bf16.vlgmr.msra.gmra.mxu0 %v402_v39  ;;  %669 = vmatmul.mubr.bf16.vlgmr.msra.gmra.mxu1 %v402_v39 }
 0x169   :  { %899 = vmatpush1.bf16.msra.mxu0 %v3475_v2  ;;  %940 = vmatpush1.bf16.msra.mxu1 %v3537_v19 }
 0x16a   :  { %900 = vmatprep.subr.bf16.mxu0 %v3478_v3  ;;  %941 = vmatprep.subr.bf16.mxu1 %v3539_v21 }
 0x16b   :  { %930 = vmatprep.mubr.bf16.mxu0 %v3405_v0  ;;  %971 = vmatprep.mubr.bf16.mxu1 %v3405_v0 }
 0x16d   :  { %901 = vmatpush1.bf16.msra.mxu0 %v3482_v4  ;;  %942 = vmatpush1.bf16.msra.mxu1 %v3545_v22 }
 0x16e   :  { %902 = vmatprep.subr.bf16.mxu0 %v3486_v5  ;;  %943 = vmatprep.subr.bf16.mxu1 %v3547_v23 }
 0x171   :  { %903 = vmatpush1.bf16.msra.mxu0 %v3490_v6  ;;  %944 = vmatpush1.bf16.msra.mxu1 %v3553_v24 }
 0x172   :  { %904 = vmatprep.subr.bf16.mxu0 %v3494_v7  ;;  %945 = vmatprep.subr.bf16.mxu1 %v3556_v25 }
 0x175   :  { %905 = vmatpush1.bf16.msra.mxu0 %v3498_v8  ;;  %946 = vmatpush1.bf16.msra.mxu1 %v3559_v26 }
 0x176   :  { %906 = vmatprep.subr.bf16.mxu0 %v3502_v9  ;;  %947 = vmatprep.subr.bf16.mxu1 %v3562_v27 }
 0x179   :  { %907 = vmatpush1.bf16.msra.mxu0 %v3506_v10  ;;  %948 = vmatpush1.bf16.msra.mxu1 %v3565_v28 }
 0x17a   :  { %908 = vmatprep.subr.bf16.mxu0 %v3510_v11  ;;  %949 = vmatprep.subr.bf16.mxu1 %v3568_v29 }
 0x17d   :  { %909 = vmatpush1.bf16.msra.mxu0 %v3514_v12  ;;  %950 = vmatpush1.bf16.msra.mxu1 %v3571_v30 }
 0x17e   :  { %910 = vmatprep.subr.bf16.mxu0 %v3518_v13  ;;  %951 = vmatprep.subr.bf16.mxu1 %v3574_v31 }
 0x181   :  { %911 = vmatpush1.bf16.msra.mxu0 %v3521_v14  ;;  %952 = vmatpush1.bf16.msra.mxu1 %v3577_v32 }
 0x182   :  { %912 = vmatprep.subr.bf16.mxu0 %v3523_v15  ;;  %953 = vmatprep.subr.bf16.mxu1 %v3580_v33 }
 0x185   :  { %913 = vmatpush1.bf16.msra.mxu0 %v3529_v16  ;;  %954 = vmatpush1.bf16.msra.mxu1 %v3583_v34 }
 0x186   :  { %1201 = vmatprep.subr.bf16.mxu0 %v3473_v1  ;;  %1242 = vmatprep.subr.bf16.mxu1 %v3531_v18  ;;  %v401_v1 = vld [vmem:[#allocation3 + $0x38] sm:$0xff] }
 0x228   :  { %v629_v41 = vpop.f32.mrf.mxu0  ;;  %v670_v42 = vpop.f32.mrf.mxu1 }
 0x229   :  { %v677_v44 = vadd.f32 %v629_v41, %v398_v40  ;;  %v679_v55 = vadd.f32 %v670_v42, %v400_v49 }
 0x22a   :  { %v631_v45 = vpop.f32.mrf.mxu0  ;;  %v672_v46 = vpop.f32.mrf.mxu1 }
 0x22b   :  { %v681_v47 = vmul.f32 0.5, %v677_v44  ;;  %v678_v48 = vadd.f32 %v631_v45, %v399_v43  ;;  %v680_v56 = vadd.f32 %v672_v46, %v401_v1  ;;  %v3724_v1 = vld [vmem:[#allocation9 + $0x80] ss:$16 sps:$4 sm:$0xff]  }
 0x22c   :  { %v633_v50 = vpop.f32.mrf.mxu0  ;;  %v674_v51 = vpop.f32.mrf.mxu1 }
 0x22d   :  { %3154 = vtanh.f32 %v681_v47  ;;  %v685_v52 = vmul.f32 0.5, %v678_v48  ;;  %v690_v57 = vmul.f32 0.5, %v680_v56  ;;  %v3726_v56 = vld [vmem:[#allocation9 + $0x88] ss:$16 sps:$4 sm:$0xff]  }
 0x22e   :  { %v634_v53 = vpop.f32.mrf.mxu0  ;;  %v675_v54 = vpop.f32.mrf.mxu1 }
 0x22f   :  { %3156 = vtanh.f32 %v685_v52  ;;  %v3702_v53 = vld [vmem:[#allocation9 + $0xe4] ss:$16 sps:$4 sm:$0xff]   ;;  %v3704_v54 = vld [vmem:[#allocation9 + $0xe0] ss:$16 sps:$4 sm:$0xff]  }
 0x230   :  { %3158 = vtanh.f32 %v679_v55  ;;  %v3710_v55 = vld [vmem:[#allocation9 + $0xc0] ss:$16 sps:$4 sm:$0xff]  }
 0x231   :  { %3160 = vtanh.f32 %v690_v57  ;;  %v3732_v57 = vld [vmem:[#allocation9 + $0x64] ss:$16 sps:$4 sm:$0xff]  }
 0x23a   :  { %v3155_v58 = vpop.eup %3154 }
 0x23b   :  { %v683_v59 = vmul.f32 0.5, %v3155_v58  ;;  %v3734_v58 = vld [vmem:[#allocation9 + $0x6c] ss:$16 sps:$4 sm:$0xff]  }
 0x23c   :  { %v3157_v60 = vpop.eup %3156 }
 0x23d   :  { %v684_v61 = vadd.f32 0.5, %v683_v59  ;;  %v687_v62 = vmul.f32 0.5, %v3157_v60  ;;  %v3159_v20 = vpop.eup %3158  ;;  %v3736_v59 = vld [vmem:[#allocation9 + $0x60] ss:$16 sps:$4 sm:$0xff]   ;;  %v3738_v60 = vld [vmem:[#allocation9 + $0x68] ss:$16 sps:$4 sm:$0xff]  }
 0x23e   :  { %v3161_v39 = vpop.eup %3160 }
 0x23f   :  { %v688_v63 = vadd.f32 0.5, %v687_v62  ;;  %v695_v36 = vmul.f32 %v3159_v20, %v684_v61  ;;  %v692_v40 = vmul.f32 0.5, %v3161_v39  ;;  %v3744_v61 = vld [vmem:[#allocation9 + $0x44] ss:$16 sps:$4 sm:$0xff]   ;;  %v3746_v62 = vld [vmem:[#allocation9 + $0x4c] ss:$16 sps:$4 sm:$0xff]  }
 0x240   :  { %v3750_v20 = vld [vmem:[#allocation9 + $0x48] ss:$16 sps:$4 sm:$0xff]  }
 0x241   :  { %v694_v35 = vmul.f32 %v688_v63, %v3605_v17  ;;  %v693_v41 = vadd.f32 0.5, %v692_v40  ;;  %v3748_v63 = vld [vmem:[#allocation9 + $0x40] ss:$16 sps:$4 sm:$0xff]   ;;  %v3762_v39 = vld [vmem:[#allocation9 + $0x28] ss:$16 sps:$4 sm:$0xff]  }
 0x242   :  { %v3768_v40 = vld [vmem:[#allocation9 + $0x4] ss:$16 sps:$4 sm:$0xff]  }
 0x243   :  { %v3647_v37 = vadd.f32 %v695_v36, %v694_v35  ;;  %v3756_v35 = vld [vmem:[#allocation9 + $0x24] ss:$16 sps:$4 sm:$0xff]   ;;  %v3758_v36 = vld [vmem:[#allocation9 + $0x2c] ss:$16 sps:$4 sm:$0xff]  }
 0x245   :  { %3162 = vtanh.f32 %v3647_v37 }
 0x252   :  { %v3163_v42 = vpop.eup %3162 }
 0x253   :  { %v3650_v43 = vmul.f32 %v3163_v42, %v693_v41  ;;  %v3770_v41 = vld [vmem:[#allocation9 + $0xc] ss:$16 sps:$4 sm:$0xff]   ;;  %v3772_v42 = vld [vmem:[#allocation9] ss:$16 sps:$4 sm:$0xff]  }
 0x255   :  { %v705_v44 = vpack.c.bf16 %v3650_v43, %v3650_v43 }
 0x257   :  { %931 = vmatmul.mubr.bf16.vlgmr.msra.gmra.mxu0 %v705_v44  ;;  %972 = vmatmul.mubr.bf16.vlgmr.msra.gmra.mxu1 %v705_v44  ;;  %v3774_v44 = vld [vmem:[#allocation9 + $0x8] ss:$16 sps:$4 sm:$0xff]  }
 0x258   :  { %1202 = vmatpush1.bf16.msra.mxu0 %v3475_v2  ;;  %1243 = vmatpush1.bf16.msra.mxu1 %v3537_v19  ;;  %v701_v2 = vld [vmem:[#allocation3 + $0x40] sm:$0xff] }
 0x259   :  { %1203 = vmatprep.subr.bf16.mxu0 %v3478_v3  ;;  %1244 = vmatprep.subr.bf16.mxu1 %v3539_v21 }
 0x25a   :  { %1233 = vmatprep.mubr.bf16.mxu0 %v3405_v0  ;;  %1274 = vmatprep.mubr.bf16.mxu1 %v3405_v0 }
 0x25c   :  { %1204 = vmatpush1.bf16.msra.mxu0 %v3482_v4  ;;  %1245 = vmatpush1.bf16.msra.mxu1 %v3545_v22 }
 0x25d   :  { %1205 = vmatprep.subr.bf16.mxu0 %v3486_v5  ;;  %1246 = vmatprep.subr.bf16.mxu1 %v3547_v23  ;;  %v702_v5 = vld [vmem:[#allocation3 + $0x48] sm:$0xff] }
 0x260   :  { %1206 = vmatpush1.bf16.msra.mxu0 %v3490_v6  ;;  %1247 = vmatpush1.bf16.msra.mxu1 %v3553_v24 }
 0x261   :  { %1207 = vmatprep.subr.bf16.mxu0 %v3494_v7  ;;  %1248 = vmatprep.subr.bf16.mxu1 %v3556_v25 }
 0x264   :  { %1208 = vmatpush1.bf16.msra.mxu0 %v3498_v8  ;;  %1249 = vmatpush1.bf16.msra.mxu1 %v3559_v26  ;;  %v704_v26 = vld [vmem:[#allocation3 + $0x58] sm:$0xff] }
 0x265   :  { %1209 = vmatprep.subr.bf16.mxu0 %v3502_v9  ;;  %1250 = vmatprep.subr.bf16.mxu1 %v3562_v27 }
 0x268   :  { %1210 = vmatpush1.bf16.msra.mxu0 %v3506_v10  ;;  %1251 = vmatpush1.bf16.msra.mxu1 %v3565_v28 }
 0x269   :  { %1211 = vmatprep.subr.bf16.mxu0 %v3510_v11  ;;  %1252 = vmatprep.subr.bf16.mxu1 %v3568_v29  ;;  %v703_v11 = vld [vmem:[#allocation3 + $0x50] sm:$0xff] }
 0x26c   :  { %1212 = vmatpush1.bf16.msra.mxu0 %v3514_v12  ;;  %1253 = vmatpush1.bf16.msra.mxu1 %v3571_v30 }
 0x26d   :  { %1213 = vmatprep.subr.bf16.mxu0 %v3518_v13  ;;  %1254 = vmatprep.subr.bf16.mxu1 %v3574_v31 }
 0x270   :  { %1214 = vmatpush1.bf16.msra.mxu0 %v3521_v14  ;;  %1255 = vmatpush1.bf16.msra.mxu1 %v3577_v32 }
 0x271   :  { %1215 = vmatprep.subr.bf16.mxu0 %v3523_v15  ;;  %1256 = vmatprep.subr.bf16.mxu1 %v3580_v33 }
 0x274   :  { %1216 = vmatpush1.bf16.msra.mxu0 %v3529_v16  ;;  %1257 = vmatpush1.bf16.msra.mxu1 %v3583_v34 }
 0x275   :  { %1545 = vmatprep.subr.bf16.mxu1 %v3531_v18  ;;  %1504 = vmatprep.subr.bf16.mxu0 %v3702_v53 }
 0x317   :  { %v932_v3 = vpop.f32.mrf.mxu0  ;;  %v973_v4 = vpop.f32.mrf.mxu1 }
 0x318   :  { %v980_v6 = vadd.f32 %v932_v3, %v701_v2  ;;  %v982_v25 = vadd.f32 %v973_v4, %v703_v11  ;;  %v1004_v2 = vld [vmem:[#allocation3 + $0x60] sm:$0xff]  ;;  %v1006_v11 = vld [vmem:[#allocation3 + $0x70] sm:$0xff] }
 0x319   :  { %v934_v7 = vpop.f32.mrf.mxu0  ;;  %v975_v8 = vpop.f32.mrf.mxu1 }
 0x31a   :  { %v984_v9 = vmul.f32 0.5, %v980_v6  ;;  %v981_v10 = vadd.f32 %v934_v7, %v702_v5  ;;  %v983_v18 = vadd.f32 %v975_v8, %v704_v26  ;;  %v1005_v5 = vld [vmem:[#allocation3 + $0x68] sm:$0xff]  ;;  %v1007_v26 = vld [vmem:[#allocation3 + $0x78] sm:$0xff] }
 0x31b   :  { %v936_v12 = vpop.f32.mrf.mxu0  ;;  %v977_v13 = vpop.f32.mrf.mxu1 }
 0x31c   :  { %3164 = vtanh.f32 %v984_v9  ;;  %v988_v14 = vmul.f32 0.5, %v981_v10  ;;  %v993_v27 = vmul.f32 0.5, %v983_v18 }
 0x31d   :  { %v937_v15 = vpop.f32.mrf.mxu0  ;;  %v978_v16 = vpop.f32.mrf.mxu1 }
 0x31e   :  { %3166 = vtanh.f32 %v988_v14 }
 0x31f   :  { %3168 = vtanh.f32 %v982_v25 }
 0x320   :  { %3170 = vtanh.f32 %v993_v27 }
 0x329   :  { %v3165_v28 = vpop.eup %3164 }
 0x32a   :  { %v986_v29 = vmul.f32 0.5, %v3165_v28 }
 0x32b   :  { %v3167_v30 = vpop.eup %3166 }
 0x32c   :  { %v987_v31 = vadd.f32 0.5, %v986_v29  ;;  %v990_v32 = vmul.f32 0.5, %v3167_v30  ;;  %v3169_v34 = vpop.eup %3168 }
 0x32d   :  { %v3171_v47 = vpop.eup %3170 }
 0x32e   :  { %v991_v33 = vadd.f32 0.5, %v990_v32  ;;  %v998_v45 = vmul.f32 %v3169_v34, %v987_v31  ;;  %v995_v48 = vmul.f32 0.5, %v3171_v47 }
 0x330   :  { %v997_v17 = vmul.f32 %v991_v33, %v3647_v37  ;;  %v996_v49 = vadd.f32 0.5, %v995_v48  ;;  %v3760_v37 = vld [vmem:[#allocation9 + $0x20] ss:$16 sps:$4 sm:$0xff]  }
 0x332   :  { %v3688_v46 = vadd.f32 %v998_v45, %v997_v17 }
 0x334   :  { %3172 = vtanh.f32 %v3688_v46 }
 0x341   :  { %v3173_v50 = vpop.eup %3172 }
 0x342   :  { %v3691_v51 = vmul.f32 %v3173_v50, %v996_v49 }
 0x344   :  { %v1008_v52 = vpack.c.bf16 %v3691_v51, %v3691_v51 }
 0x346   :  { %1234 = vmatmul.mubr.bf16.vlgmr.msra.gmra.mxu0 %v1008_v52  ;;  %1275 = vmatmul.mubr.bf16.vlgmr.msra.gmra.mxu1 %v1008_v52 }
 0x347   :  { %1546 = vmatpush1.bf16.msra.mxu1 %v3537_v19  ;;  %1536 = vmatprep.mubr.bf16.mxu0 %v3405_v0  ;;  %v3708_v19 = vld [vmem:[#allocation9 + $0xc4] ss:$16 sps:$4 sm:$0xff]  }
 0x348   :  { %1547 = vmatprep.subr.bf16.mxu1 %v3539_v21  ;;  %1577 = vmatprep.mubr.bf16.mxu1 %v3405_v0  ;;  %v3714_v21 = vld [vmem:[#allocation9 + $0xa4] ss:$16 sps:$4 sm:$0xff]  }
 0x349   :  { %1505 = vmatpush1.bf16.msra.mxu0 %v3704_v54 }
 0x34a   :  { %1506 = vmatprep.subr.bf16.mxu0 %v3708_v19 }
 0x34b   :  { %1548 = vmatpush1.bf16.msra.mxu1 %v3545_v22  ;;  %v3716_v22 = vld [vmem:[#allocation9 + $0xa0] ss:$16 sps:$4 sm:$0xff]  }
 0x34c   :  { %1549 = vmatprep.subr.bf16.mxu1 %v3547_v23  ;;  %v3720_v23 = vld [vmem:[#allocation9 + $0x84] ss:$16 sps:$4 sm:$0xff]  }
 0x34d   :  { %1507 = vmatpush1.bf16.msra.mxu0 %v3710_v55 }
 0x34e   :  { %1508 = vmatprep.subr.bf16.mxu0 %v3714_v21 }
 0x34f   :  { %1550 = vmatpush1.bf16.msra.mxu1 %v3553_v24  ;;  %v3722_v24 = vld [vmem:[#allocation9 + $0x8c] ss:$16 sps:$4 sm:$0xff]  }
 0x350   :  { %1551 = vmatprep.subr.bf16.mxu1 %v3722_v24 }
 0x351   :  { %1509 = vmatpush1.bf16.msra.mxu0 %v3716_v22 }
 0x352   :  { %1510 = vmatprep.subr.bf16.mxu0 %v3720_v23 }
 0x353   :  { %1552 = vmatpush1.bf16.msra.mxu1 %v3726_v56 }
 0x354   :  { %1553 = vmatprep.subr.bf16.mxu1 %v3734_v58 }
 0x355   :  { %1511 = vmatpush1.bf16.msra.mxu0 %v3724_v1 }
 0x356   :  { %1512 = vmatprep.subr.bf16.mxu0 %v3732_v57 }
 0x357   :  { %1554 = vmatpush1.bf16.msra.mxu1 %v3738_v60 }
 0x358   :  { %1555 = vmatprep.subr.bf16.mxu1 %v3746_v62 }
 0x359   :  { %1513 = vmatpush1.bf16.msra.mxu0 %v3736_v59 }
 0x35a   :  { %1514 = vmatprep.subr.bf16.mxu0 %v3744_v61 }
 0x35b   :  { %1556 = vmatpush1.bf16.msra.mxu1 %v3750_v20 }
 0x35c   :  { %1557 = vmatprep.subr.bf16.mxu1 %v3758_v36 }
 0x35d   :  { %1515 = vmatpush1.bf16.msra.mxu0 %v3748_v63 }
 0x35e   :  { %1516 = vmatprep.subr.bf16.mxu0 %v3756_v35 }
 0x35f   :  { %1558 = vmatpush1.bf16.msra.mxu1 %v3762_v39 }
 0x360   :  { %1559 = vmatprep.subr.bf16.mxu1 %v3770_v41 }
 0x361   :  { %1517 = vmatpush1.bf16.msra.mxu0 %v3760_v37 }
 0x362   :  { %1518 = vmatprep.subr.bf16.mxu0 %v3768_v40 }
 0x363   :  { %1560 = vmatpush1.bf16.msra.mxu1 %v3774_v44 }
 0x365   :  { %1519 = vmatpush1.bf16.msra.mxu0 %v3772_v42 }
 0x366   :  { %1807 = vmatprep.subr.bf16.mxu0 %v3702_v53 }
 0x406   :  { %v1235_v3 = vpop.f32.mrf.mxu0  ;;  %v1276_v4 = vpop.f32.mrf.mxu1 }
 0x407   :  { %v1283_v6 = vadd.f32 %v1235_v3, %v1004_v2  ;;  %v1285_v25 = vadd.f32 %v1276_v4, %v1006_v11  ;;  %v3809_v4 = vld [vmem:[#allocation9 + $0xe8] ss:$16 sps:$4 sm:$0xff]  }
 0x408   :  { %v1237_v7 = vpop.f32.mrf.mxu0  ;;  %v1278_v8 = vpop.f32.mrf.mxu1 }
 0x409   :  { %v1287_v9 = vmul.f32 0.5, %v1283_v6  ;;  %v1284_v10 = vadd.f32 %v1237_v7, %v1005_v5  ;;  %v1286_v18 = vadd.f32 %v1278_v8, %v1007_v26  ;;  %v3813_v5 = vld [vmem:[#allocation9 + $0xcc] ss:$16 sps:$4 sm:$0xff]   ;;  %v3815_v6 = vld [vmem:[#allocation9 + $0xc8] ss:$16 sps:$4 sm:$0xff]   ;;  %v1309_v26 = vld [vmem:[#allocation3 + $0x90] sm:$0xff] }
 0x40a   :  { %v1239_v12 = vpop.f32.mrf.mxu0  ;;  %v1280_v13 = vpop.f32.mrf.mxu1  ;;  %v3819_v7 = vld [vmem:[#allocation9 + $0xac] ss:$16 sps:$4 sm:$0xff]   ;;  %v3821_v8 = vld [vmem:[#allocation9 + $0xa8] ss:$16 sps:$4 sm:$0xff]  }
 0x40b   :  { %3174 = vtanh.f32 %v1287_v9  ;;  %v1291_v14 = vmul.f32 0.5, %v1284_v10  ;;  %v1296_v27 = vmul.f32 0.5, %v1286_v18  ;;  %v1307_v9 = vld [vmem:[#allocation3 + $0x80] sm:$0xff]  ;;  %v1308_v12 = vld [vmem:[#allocation3 + $0x88] sm:$0xff] }
 0x40c   :  { %v1240_v15 = vpop.f32.mrf.mxu0  ;;  %v1281_v16 = vpop.f32.mrf.mxu1 }
 0x40d   :  { %3176 = vtanh.f32 %v1291_v14 }
 0x40e   :  { %3178 = vtanh.f32 %v1285_v25 }
 0x40f   :  { %3180 = vtanh.f32 %v1296_v27 }
 0x418   :  { %v3175_v28 = vpop.eup %3174 }
 0x419   :  { %v1289_v29 = vmul.f32 0.5, %v3175_v28 }
 0x41a   :  { %v3177_v30 = vpop.eup %3176 }
 0x41b   :  { %v1290_v31 = vadd.f32 0.5, %v1289_v29  ;;  %v1293_v32 = vmul.f32 0.5, %v3177_v30  ;;  %v3179_v34 = vpop.eup %3178 }
 0x41c   :  { %v3181_v48 = vpop.eup %3180 }
 0x41d   :  { %v1294_v33 = vadd.f32 0.5, %v1293_v32  ;;  %v1301_v45 = vmul.f32 %v3179_v34, %v1290_v31  ;;  %v1298_v49 = vmul.f32 0.5, %v3181_v48  ;;  %v1310_v32 = vld [vmem:[#allocation3 + $0x98] sm:$0xff] }
 0x41f   :  { %v1300_v17 = vmul.f32 %v1294_v33, %v3688_v46  ;;  %v1299_v50 = vadd.f32 0.5, %v1298_v49  ;;  %v3807_v46 = vld [vmem:[#allocation9 + $0xec] ss:$16 sps:$4 sm:$0xff]  }
 0x420   :  { %1848 = vmatprep.subr.bf16.mxu1 %v3807_v46 }
 0x421   :  { %v3782_v47 = vadd.f32 %v1301_v45, %v1300_v17 }
 0x423   :  { %3182 = vtanh.f32 %v3782_v47 }
 0x430   :  { %v3183_v52 = vpop.eup %3182 }
 0x431   :  { %v3785_v2 = vmul.f32 %v3183_v52, %v1299_v50 }
 0x433   :  { %v1311_v3 = vpack.c.bf16 %v3785_v2, %v3785_v2 }
 0x435   :  { %1537 = vmatmul.mubr.bf16.vlgmr.msra.gmra.mxu0 %v1311_v3  ;;  %1578 = vmatmul.mubr.bf16.vlgmr.msra.gmra.mxu1 %v1311_v3 }
 0x436   :  { %1808 = vmatpush1.bf16.msra.mxu0 %v3704_v54  ;;  %1839 = vmatprep.mubr.bf16.mxu0 %v3405_v0 }
 0x437   :  { %1809 = vmatprep.subr.bf16.mxu0 %v3708_v19  ;;  %1880 = vmatprep.mubr.bf16.mxu1 %v3405_v0 }
 0x438   :  { %1849 = vmatpush1.bf16.msra.mxu1 %v3809_v4 }
 0x439   :  { %1850 = vmatprep.subr.bf16.mxu1 %v3813_v5 }
 0x43a   :  { %1810 = vmatpush1.bf16.msra.mxu0 %v3710_v55 }
 0x43b   :  { %1811 = vmatprep.subr.bf16.mxu0 %v3714_v21 }
 0x43c   :  { %1851 = vmatpush1.bf16.msra.mxu1 %v3815_v6 }
 0x43d   :  { %1852 = vmatprep.subr.bf16.mxu1 %v3819_v7 }
 0x43e   :  { %1812 = vmatpush1.bf16.msra.mxu0 %v3716_v22 }
 0x43f   :  { %1813 = vmatprep.subr.bf16.mxu0 %v3720_v23 }
 0x440   :  { %1853 = vmatpush1.bf16.msra.mxu1 %v3821_v8 }
 0x441   :  { %1854 = vmatprep.subr.bf16.mxu1 %v3722_v24 }
 0x442   :  { %1814 = vmatpush1.bf16.msra.mxu0 %v3724_v1 }
 0x443   :  { %1815 = vmatprep.subr.bf16.mxu0 %v3732_v57 }
 0x444   :  { %1855 = vmatpush1.bf16.msra.mxu1 %v3726_v56 }
 0x445   :  { %1856 = vmatprep.subr.bf16.mxu1 %v3734_v58 }
 0x446   :  { %1816 = vmatpush1.bf16.msra.mxu0 %v3736_v59 }
 0x447   :  { %1817 = vmatprep.subr.bf16.mxu0 %v3744_v61 }
 0x448   :  { %1857 = vmatpush1.bf16.msra.mxu1 %v3738_v60 }
 0x449   :  { %1858 = vmatprep.subr.bf16.mxu1 %v3746_v62 }
 0x44a   :  { %1818 = vmatpush1.bf16.msra.mxu0 %v3748_v63 }
 0x44b   :  { %1819 = vmatprep.subr.bf16.mxu0 %v3756_v35 }
 0x44c   :  { %1859 = vmatpush1.bf16.msra.mxu1 %v3750_v20 }
 0x44d   :  { %1860 = vmatprep.subr.bf16.mxu1 %v3758_v36 }
 0x44e   :  { %1820 = vmatpush1.bf16.msra.mxu0 %v3760_v37 }
 0x44f   :  { %1821 = vmatprep.subr.bf16.mxu0 %v3768_v40 }
 0x450   :  { %1861 = vmatpush1.bf16.msra.mxu1 %v3762_v39 }
 0x451   :  { %1862 = vmatprep.subr.bf16.mxu1 %v3770_v41 }
 0x452   :  { %1822 = vmatpush1.bf16.msra.mxu0 %v3772_v42 }
 0x453   :  { %2110 = vmatprep.subr.bf16.mxu0 %v3702_v53 }
 0x454   :  { %1863 = vmatpush1.bf16.msra.mxu1 %v3774_v44 }
 0x455   :  { %2151 = vmatprep.subr.bf16.mxu1 %v3807_v46 }
 0x4f5   :  { %v1538_v10 = vpop.f32.mrf.mxu0  ;;  %v1579_v11 = vpop.f32.mrf.mxu1 }
 0x4f6   :  { %v1586_v13 = vadd.f32 %v1538_v10, %v1307_v9  ;;  %v1588_v31 = vadd.f32 %v1579_v11, %v1309_v26 }
 0x4f7   :  { %v1540_v14 = vpop.f32.mrf.mxu0  ;;  %v1581_v15 = vpop.f32.mrf.mxu1 }
 0x4f8   :  { %v1590_v16 = vmul.f32 0.5, %v1586_v13  ;;  %v1587_v25 = vadd.f32 %v1540_v14, %v1308_v12  ;;  %v1589_v33 = vadd.f32 %v1581_v15, %v1310_v32 }
 0x4f9   :  { %v1542_v18 = vpop.f32.mrf.mxu0  ;;  %v1583_v27 = vpop.f32.mrf.mxu1 }
 0x4fa   :  { %3184 = vtanh.f32 %v1590_v16  ;;  %v1594_v28 = vmul.f32 0.5, %v1587_v25  ;;  %v1599_v34 = vmul.f32 0.5, %v1589_v33  ;;  %v1611_v27 = vld [vmem:[#allocation3 + $0xa8] sm:$0xff]  ;;  %v1612_v33 = vld [vmem:[#allocation3 + $0xb0] sm:$0xff] }
 0x4fb   :  { %v1543_v29 = vpop.f32.mrf.mxu0  ;;  %v1584_v30 = vpop.f32.mrf.mxu1 }
 0x4fc   :  { %3186 = vtanh.f32 %v1594_v28 }
 0x4fd   :  { %3188 = vtanh.f32 %v1588_v31 }
 0x4fe   :  { %3190 = vtanh.f32 %v1599_v34 }
 0x507   :  { %v3185_v17 = vpop.eup %3184 }
 0x508   :  { %v1592_v45 = vmul.f32 0.5, %v3185_v17 }
 0x509   :  { %v3187_v48 = vpop.eup %3186 }
 0x50a   :  { %v1593_v49 = vadd.f32 0.5, %v1592_v45  ;;  %v1596_v50 = vmul.f32 0.5, %v3187_v48  ;;  %v3189_v3 = vpop.eup %3188 }
 0x50b   :  { %v3191_v11 = vpop.eup %3190 }
 0x50c   :  { %v1597_v52 = vadd.f32 0.5, %v1596_v50  ;;  %v1604_v10 = vmul.f32 %v3189_v3, %v1593_v49  ;;  %v1601_v13 = vmul.f32 0.5, %v3191_v11 }
 0x50e   :  { %v1603_v9 = vmul.f32 %v1597_v52, %v3782_v47  ;;  %v1602_v14 = vadd.f32 0.5, %v1601_v13  ;;  %v1610_v47 = vld [vmem:[#allocation3 + $0xa0] sm:$0xff] }
 0x510   :  { %v3837_v12 = vadd.f32 %v1604_v10, %v1603_v9 }
 0x512   :  { %3192 = vtanh.f32 %v3837_v12 }
 0x51f   :  { %v3193_v15 = vpop.eup %3192 }
 0x520   :  { %v3840_v16 = vmul.f32 %v3193_v15, %v1602_v14 }
 0x522   :  { %v1614_v25 = vpack.c.bf16 %v3840_v16, %v3840_v16 }
 0x524   :  { %1840 = vmatmul.mubr.bf16.vlgmr.msra.gmra.mxu0 %v1614_v25  ;;  %1881 = vmatmul.mubr.bf16.vlgmr.msra.gmra.mxu1 %v1614_v25 }
 0x525   :  { %2111 = vmatpush1.bf16.msra.mxu0 %v3704_v54  ;;  %2152 = vmatpush1.bf16.msra.mxu1 %v3809_v4 }
 0x526   :  { %2112 = vmatprep.subr.bf16.mxu0 %v3708_v19  ;;  %2153 = vmatprep.subr.bf16.mxu1 %v3813_v5 }
 0x527   :  { %2142 = vmatprep.mubr.bf16.mxu0 %v3405_v0  ;;  %2183 = vmatprep.mubr.bf16.mxu1 %v3405_v0 }
 0x529   :  { %2113 = vmatpush1.bf16.msra.mxu0 %v3710_v55  ;;  %2154 = vmatpush1.bf16.msra.mxu1 %v3815_v6 }
 0x52a   :  { %2114 = vmatprep.subr.bf16.mxu0 %v3714_v21  ;;  %2155 = vmatprep.subr.bf16.mxu1 %v3819_v7 }
 0x52d   :  { %2115 = vmatpush1.bf16.msra.mxu0 %v3716_v22  ;;  %2156 = vmatpush1.bf16.msra.mxu1 %v3821_v8 }
 0x52e   :  { %2116 = vmatprep.subr.bf16.mxu0 %v3720_v23  ;;  %2157 = vmatprep.subr.bf16.mxu1 %v3722_v24 }
 0x531   :  { %2117 = vmatpush1.bf16.msra.mxu0 %v3724_v1  ;;  %2158 = vmatpush1.bf16.msra.mxu1 %v3726_v56 }
 0x532   :  { %2118 = vmatprep.subr.bf16.mxu0 %v3732_v57  ;;  %2159 = vmatprep.subr.bf16.mxu1 %v3734_v58 }
 0x535   :  { %2119 = vmatpush1.bf16.msra.mxu0 %v3736_v59  ;;  %2160 = vmatpush1.bf16.msra.mxu1 %v3738_v60 }
 0x536   :  { %2120 = vmatprep.subr.bf16.mxu0 %v3744_v61  ;;  %2161 = vmatprep.subr.bf16.mxu1 %v3746_v62 }
 0x539   :  { %2121 = vmatpush1.bf16.msra.mxu0 %v3748_v63  ;;  %2162 = vmatpush1.bf16.msra.mxu1 %v3750_v20 }
 0x53a   :  { %2122 = vmatprep.subr.bf16.mxu0 %v3756_v35  ;;  %2163 = vmatprep.subr.bf16.mxu1 %v3758_v36 }
 0x53d   :  { %2123 = vmatpush1.bf16.msra.mxu0 %v3760_v37  ;;  %2164 = vmatpush1.bf16.msra.mxu1 %v3762_v39 }
 0x53e   :  { %2124 = vmatprep.subr.bf16.mxu0 %v3768_v40  ;;  %2165 = vmatprep.subr.bf16.mxu1 %v3770_v41 }
 0x541   :  { %2125 = vmatpush1.bf16.msra.mxu0 %v3772_v42  ;;  %2166 = vmatpush1.bf16.msra.mxu1 %v3774_v44 }
 0x542   :  { %2413 = vmatprep.subr.bf16.mxu0 %v3702_v53  ;;  %2454 = vmatprep.subr.bf16.mxu1 %v3807_v46  ;;  %v1613_v53 = vld [vmem:[#allocation3 + $0xb8] sm:$0xff] }
 0x5e4   :  { %v1841_v26 = vpop.f32.mrf.mxu0  ;;  %v1882_v18 = vpop.f32.mrf.mxu1 }
 0x5e5   :  { %v1889_v28 = vadd.f32 %v1841_v26, %v1610_v47  ;;  %v1891_v50 = vadd.f32 %v1882_v18, %v1612_v33 }
 0x5e6   :  { %v1843_v29 = vpop.f32.mrf.mxu0  ;;  %v1884_v30 = vpop.f32.mrf.mxu1 }
 0x5e7   :  { %v1893_v31 = vmul.f32 0.5, %v1889_v28  ;;  %v1890_v32 = vadd.f32 %v1843_v29, %v1611_v27  ;;  %v1892_v46 = vadd.f32 %v1884_v30, %v1613_v53  ;;  %v3140_v53 = vld [vmem:[#allocation11 + $0x18] sm:$0xff]  }
 0x5e8   :  { %v1845_v34 = vpop.f32.mrf.mxu0  ;;  %v1886_v17 = vpop.f32.mrf.mxu1 }
 0x5e9   :  { %3194 = vtanh.f32 %v1893_v31  ;;  %v1897_v45 = vmul.f32 0.5, %v1890_v32  ;;  %v1902_v52 = vmul.f32 0.5, %v1892_v46  ;;  %v3141_v46 = vld [vmem:[#allocation11 + $0x10] sm:$0xff]  }
 0x5ea   :  { %v1846_v48 = vpop.f32.mrf.mxu0  ;;  %v1887_v49 = vpop.f32.mrf.mxu1 }
 0x5eb   :  { %3196 = vtanh.f32 %v1897_v45  ;;  %v3137_v45 = vld [vmem:[#allocation11 + $0x30] sm:$0xff]   ;;  %v2528_v48 = vpack.c.bf16 %v3650_v43, %v3608_v38  ;;  %v3138_v49 = vld [vmem:[#allocation11 + $0x28] sm:$0xff]   ;;  %v3143_v38 = vld [vmem:[#allocation11] sm:$0xff]   ;;  %v2529_v43 = vpack.c.bf16 %v3785_v2, %v3691_v51 }
 0x5ec   :  { %3198 = vtanh.f32 %v1891_v50  ;;  %v3139_v50 = vld [vmem:[#allocation11 + $0x20] sm:$0xff]  }
 0x5ed   :  { %3200 = vtanh.f32 %v1902_v52  ;;  %v3142_v52 = vld [vmem:[#allocation11 + $0x8] sm:$0xff]  }
 0x5f6   :  { %v3195_v3 = vpop.eup %3194 }
 0x5f7   :  { %v1895_v9 = vmul.f32 0.5, %v3195_v3 }
 0x5f8   :  { %v3197_v10 = vpop.eup %3196 }
 0x5f9   :  { %v1896_v11 = vadd.f32 0.5, %v1895_v9  ;;  %v1899_v13 = vmul.f32 0.5, %v3197_v10  ;;  %v3199_v15 = vpop.eup %3198  ;;  %v2216_v9 = vld [vmem:[#allocation3 + $0xe0] sm:$0xff] }
 0x5fa   :  { %v3201_v18 = vpop.eup %3200 }
 0x5fb   :  { %v1900_v14 = vadd.f32 0.5, %v1899_v13  ;;  %v1907_v47 = vmul.f32 %v3199_v15, %v1896_v11  ;;  %v1904_v27 = vmul.f32 0.5, %v3201_v18  ;;  %v2217_v13 = vld [vmem:[#allocation3 + $0xe8] sm:$0xff]  ;;  %v2218_v18 = vld [vmem:[#allocation3 + $0xf0] sm:$0xff] }
 0x5fd   :  { %v1906_v25 = vmul.f32 %v1900_v14, %v3837_v12  ;;  %v1905_v28 = vadd.f32 0.5, %v1904_v27 }
 0x5ff   :  { %v3879_v26 = vadd.f32 %v1907_v47, %v1906_v25 }
 0x601   :  { %3202 = vtanh.f32 %v3879_v26 }
 0x60e   :  { %v3203_v29 = vpop.eup %3202 }
 0x60f   :  { %v3882_v30 = vmul.f32 %v3203_v29, %v1905_v28 }
 0x611   :  { %v1917_v31 = vpack.c.bf16 %v3882_v30, %v3882_v30  ;;  %v2530_v3 = vpack.c.bf16 %v3882_v30, %v3840_v16  ;;  %v2219_v16 = vld [vmem:[#allocation3 + $0xf8] sm:$0xff] }
 0x613   :  { %2143 = vmatmul.mubr.bf16.vlgmr.msra.gmra.mxu0 %v1917_v31  ;;  %2184 = vmatmul.mubr.bf16.vlgmr.msra.gmra.mxu1 %v1917_v31 }
 0x614   :  { %2414 = vmatpush1.bf16.msra.mxu0 %v3704_v54  ;;  %2455 = vmatpush1.bf16.msra.mxu1 %v3809_v4  ;;  %v1913_v54 = vld [vmem:[#allocation3 + $0xc0] sm:$0xff] }
 0x615   :  { %2415 = vmatprep.subr.bf16.mxu0 %v3708_v19  ;;  %2456 = vmatprep.subr.bf16.mxu1 %v3813_v5 }
 0x616   :  { %2445 = vmatprep.mubr.bf16.mxu0 %v3405_v0  ;;  %2486 = vmatprep.mubr.bf16.mxu1 %v3405_v0  ;;  %v3136_v0 = vld [vmem:[#allocation11 + $0x38] sm:$0xff]  }
 0x618   :  { %2416 = vmatpush1.bf16.msra.mxu0 %v3710_v55  ;;  %2457 = vmatpush1.bf16.msra.mxu1 %v3815_v6 }
 0x619   :  { %2417 = vmatprep.subr.bf16.mxu0 %v3714_v21  ;;  %2458 = vmatprep.subr.bf16.mxu1 %v3819_v7  ;;  %v1914_v21 = vld [vmem:[#allocation3 + $0xc8] sm:$0xff] }
 0x61c   :  { %2418 = vmatpush1.bf16.msra.mxu0 %v3716_v22  ;;  %2459 = vmatpush1.bf16.msra.mxu1 %v3821_v8 }
 0x61d   :  { %2419 = vmatprep.subr.bf16.mxu0 %v3720_v23  ;;  %2460 = vmatprep.subr.bf16.mxu1 %v3722_v24 }
 0x620   :  { %2420 = vmatpush1.bf16.msra.mxu0 %v3724_v1  ;;  %2461 = vmatpush1.bf16.msra.mxu1 %v3726_v56 }
 0x621   :  { %2421 = vmatprep.subr.bf16.mxu0 %v3732_v57  ;;  %2462 = vmatprep.subr.bf16.mxu1 %v3734_v58  ;;  %v1915_v57 = vld [vmem:[#allocation3 + $0xd0] sm:$0xff] }
 0x624   :  { %2422 = vmatpush1.bf16.msra.mxu0 %v3736_v59  ;;  %2463 = vmatpush1.bf16.msra.mxu1 %v3738_v60 }
 0x625   :  { %2423 = vmatprep.subr.bf16.mxu0 %v3744_v61  ;;  %2464 = vmatprep.subr.bf16.mxu1 %v3746_v62 }
 0x628   :  { %2424 = vmatpush1.bf16.msra.mxu0 %v3748_v63  ;;  %2465 = vmatpush1.bf16.msra.mxu1 %v3750_v20  ;;  %v1916_v20 = vld [vmem:[#allocation3 + $0xd8] sm:$0xff] }
 0x629   :  { %2425 = vmatprep.subr.bf16.mxu0 %v3756_v35  ;;  %2466 = vmatprep.subr.bf16.mxu1 %v3758_v36 }
 0x62c   :  { %2426 = vmatpush1.bf16.msra.mxu0 %v3760_v37  ;;  %2467 = vmatpush1.bf16.msra.mxu1 %v3762_v39 }
 0x62d   :  { %2427 = vmatprep.subr.bf16.mxu0 %v3768_v40  ;;  %2468 = vmatprep.subr.bf16.mxu1 %v3770_v41 }
 0x630   :  { %2428 = vmatpush1.bf16.msra.mxu0 %v3772_v42  ;;  %2469 = vmatpush1.bf16.msra.mxu1 %v3774_v44 }
 0x631   :  { %2999 = vmatprep.subr.bf16.mxu0 %v3136_v0 }
 0x6d3   :  { %v2144_v19 = vpop.f32.mrf.mxu0  ;;  %v2185_v55 = vpop.f32.mrf.mxu1 }
 0x6d4   :  { %v2192_v22 = vadd.f32 %v2144_v19, %v1913_v54  ;;  %v2194_v63 = vadd.f32 %v2185_v55, %v1915_v57 }
 0x6d5   :  { %v2146_v23 = vpop.f32.mrf.mxu0  ;;  %v2187_v24 = vpop.f32.mrf.mxu1 }
 0x6d6   :  { %v2196_v1 = vmul.f32 0.5, %v2192_v22  ;;  %v2193_v56 = vadd.f32 %v2146_v23, %v1914_v21  ;;  %v2195_v35 = vadd.f32 %v2187_v24, %v1916_v20 }
 0x6d7   :  { %v2148_v58 = vpop.f32.mrf.mxu0  ;;  %v2189_v59 = vpop.f32.mrf.mxu1 }
 0x6d8   :  { %3204 = vtanh.f32 %v2196_v1  ;;  %v2200_v60 = vmul.f32 0.5, %v2193_v56  ;;  %v2205_v36 = vmul.f32 0.5, %v2195_v35  ;;  %v2978_v58 = vld [vmem:[%s3951_s5] ss:$0 sm:$0xff]  ;;  %s3406_s5 = smov [#allocation13]  }
 0x6d9   :  { %v2149_v61 = vpop.f32.mrf.mxu0  ;;  %v2190_v62 = vpop.f32.mrf.mxu1  ;;  %s2694_s11 = sshll.u32 %s3406_s5, 4  ;;  %s2695_s11 = int_to_ptr.vmem [resolvable:$true] %s2694_s11 }
 0x6da   :  { %3206 = vtanh.f32 %v2200_v60  ;;  %s3324_s12 = scalar_lea.vmem %s2695_s11, 128  ;;  %p3329_p12 = scmp.lt.s32.totalorder %s2695_s11, %s2695_s11 }
 0x6db   :  { %3208 = vtanh.f32 %v2194_v63  ;;  %p3325_p11 = scmp.ne.s32.totalorder %s2695_s11, %s3324_s12  ;;  %p3330_p13 = scmp.lt.s32.totalorder %s3324_s12, %s3324_s12 }
 0x6dc   :  { %3210 = vtanh.f32 %v2205_v36 }
 0x6dd   :  { %p3331_p0 = por %p3330_p13, %p3329_p12 }
 0x6df   :  { %p3332_p1 = pnand %p3331_p0, %p3325_p11 }
 0x6e5   :  { %v3205_v37 = vpop.eup %3204 }
 0x6e6   :  { %v2198_v39 = vmul.f32 0.5, %v3205_v37 }
 0x6e7   :  { %v3207_v40 = vpop.eup %3206 }
 0x6e8   :  { %v2199_v41 = vadd.f32 0.5, %v2198_v39  ;;  %v2202_v42 = vmul.f32 0.5, %v3207_v40  ;;  %v3209_v4 = vpop.eup %3208 }
 0x6e9   :  { %v3211_v8 = vpop.eup %3210 }
 0x6ea   :  { %v2203_v44 = vadd.f32 0.5, %v2202_v42  ;;  %v2210_v6 = vmul.f32 %v3209_v4, %v2199_v41  ;;  %v2207_v12 = vmul.f32 0.5, %v3211_v8 }
 0x6ec   :  { %v2209_v5 = vmul.f32 %v2203_v44, %v3879_v26  ;;  %v2208_v32 = vadd.f32 0.5, %v2207_v12 }
 0x6ee   :  { %v3919_v7 = vadd.f32 %v2210_v6, %v2209_v5 }
 0x6f0   :  { %3212 = vtanh.f32 %v3919_v7 }
 0x6fd   :  { %v3213_v33 = vpop.eup %3212 }
 0x6fe   :  { %v3922_v34 = vmul.f32 %v3213_v33, %v2208_v32 }
 0x700   :  { %v2220_v17 = vpack.c.bf16 %v3922_v34, %v3922_v34 }
 0x702   :  { %2446 = vmatmul.mubr.bf16.vlgmr.msra.gmra.mxu0 %v2220_v17  ;;  %2487 = vmatmul.mubr.bf16.vlgmr.msra.gmra.mxu1 %v2220_v17 }
 0x703   :  { %3000 = vmatpush3.bf16.msra.mxu0 %v3136_v0  ;;  %3015 = vmatprep.mubr.bf16.mxu0 %v2528_v48 }
 0x704   :  { %3001 = vmatprep.subr.bf16.mxu0 %v3137_v45 }
 0x707   :  { %3002 = vmatpush3.bf16.msra.mxu0 %v3137_v45 }
 0x708   :  { %3003 = vmatprep.subr.bf16.mxu0 %v3138_v49 }
 0x70b   :  { %3004 = vmatpush3.bf16.msra.mxu0 %v3138_v49 }
 0x70c   :  { %3005 = vmatprep.subr.bf16.mxu0 %v3139_v50 }
 0x70f   :  { %3006 = vmatpush3.bf16.msra.mxu0 %v3139_v50 }
 0x710   :  { %3007 = vmatprep.subr.bf16.mxu0 %v3140_v53 }
 0x713   :  { %3008 = vmatpush3.bf16.msra.mxu0 %v3140_v53 }
 0x714   :  { %3009 = vmatprep.subr.bf16.mxu0 %v3141_v46 }
 0x717   :  { %3010 = vmatpush3.bf16.msra.mxu0 %v3141_v46 }
 0x718   :  { %3011 = vmatprep.subr.bf16.mxu0 %v3142_v52 }
 0x71b   :  { %3012 = vmatpush3.bf16.msra.mxu0 %v3142_v52 }
 0x71c   :  { %3013 = vmatprep.subr.bf16.mxu0 %v3143_v38 }
 0x71f   :  { %3014 = vmatpush3.bf16.msra.mxu0 %v3143_v38 }
 0x722   :  { %3016 = vmatmul.mubr.bf16.vlgmr.msra.gmra.mxu0 %v2529_v43 }
 0x723   :  { %3019 = vmatprep.mubr.bf16.mxu0 %v2530_v3 }
 0x7c2   :  { %v2447_v10 = vpop.f32.mrf.mxu0  ;;  %v2488_v11 = vpop.f32.mrf.mxu1 }
 0x7c3   :  { %v2495_v14 = vadd.f32 %v2447_v10, %v2216_v9  ;;  %v2497_v31 = vadd.f32 %v2488_v11, %v2218_v18 }
 0x7c4   :  { %v2449_v15 = vpop.f32.mrf.mxu0  ;;  %v2490_v25 = vpop.f32.mrf.mxu1 }
 0x7c5   :  { %v2499_v47 = vmul.f32 0.5, %v2495_v14  ;;  %v2496_v26 = vadd.f32 %v2449_v15, %v2217_v13  ;;  %v2498_v30 = vadd.f32 %v2490_v25, %v2219_v16 }
 0x7c6   :  { %v2451_v27 = vpop.f32.mrf.mxu0  ;;  %v2492_v28 = vpop.f32.mrf.mxu1 }
 0x7c7   :  { %3214 = vtanh.f32 %v2499_v47  ;;  %v2503_v29 = vmul.f32 0.5, %v2496_v26  ;;  %v2508_v0 = vmul.f32 0.5, %v2498_v30 }
 0x7c8   :  { %v2452_v51 = vpop.f32.mrf.mxu0  ;;  %v2493_v2 = vpop.f32.mrf.mxu1 }
 0x7c9   :  { %3216 = vtanh.f32 %v2503_v29 }
 0x7ca   :  { %3218 = vtanh.f32 %v2497_v31 }
 0x7cb   :  { %3220 = vtanh.f32 %v2508_v0 }
 0x7d4   :  { %v3215_v54 = vpop.eup %3214 }
 0x7d5   :  { %v2501_v19 = vmul.f32 0.5, %v3215_v54 }
 0x7d6   :  { %v3217_v55 = vpop.eup %3216 }
 0x7d7   :  { %v2502_v21 = vadd.f32 0.5, %v2501_v19  ;;  %v2505_v22 = vmul.f32 0.5, %v3217_v55  ;;  %v3219_v24 = vpop.eup %3218 }
 0x7d8   :  { %v3221_v61 = vpop.eup %3220 }
 0x7d9   :  { %v2506_v23 = vadd.f32 0.5, %v2505_v22  ;;  %v2513_v56 = vmul.f32 %v3219_v24, %v2502_v21  ;;  %v2510_v35 = vmul.f32 0.5, %v3221_v61 }
 0x7db   :  { %v2512_v1 = vmul.f32 %v2506_v23, %v3919_v7  ;;  %v2511_v40 = vadd.f32 0.5, %v2510_v35 }
 0x7dd   :  { %v2514_v57 = vadd.f32 %v2513_v56, %v2512_v1 }
 0x7df   :  { %3222 = vtanh.f32 %v2514_v57  ;;  %2519 = vst [vmem:[#allocation15] sm:$0xff] %v2514_v57 }
 0x7e2   :  { %v3017_v59 = vpop.f32.mrf.mxu0 }
 0x7e3   :  { %v2646_v60 = vadd.f32 %v3017_v59, %v2978_v58 }
 0x7e4   :  { %v2637_v62 = vpop.f32.mrf.mxu0 }
 0x7e5   :  { %2670 = vst [vmem:[#allocation12 + $0x10] sm:$0xff] %v2646_v60  ;;  %v2638_v63 = vadd.f32 %v2978_v58, %v2637_v62 }
 0x7e6   :  { %v3018_v20 = vpop.f32.mrf.mxu0 }
 0x7e7   :  { %2668 = vst [vmem:[#allocation12] sm:$0xff] %v2638_v63  ;;  %v2649_v36 = vadd.f32 %v3018_v20, %v2978_v58 }
 0x7e8   :  { %v2640_v37 = vpop.f32.mrf.mxu0 }
 0x7e9   :  { %2671 = vst [vmem:[#allocation12 + $0x18] sm:$0xff] %v2649_v36  ;;  %v2641_v39 = vadd.f32 %v2978_v58, %v2640_v37 }
 0x7eb   :  { %2669 = vst [vmem:[#allocation12 + $0x8] sm:$0xff] %v2641_v39 }
 0x7ec   :  { %v3223_v41 = vpop.eup %3222 }
 0x7ed   :  { %v2516_v42 = vmul.f32 %v3223_v41, %v2511_v40 }
 0x7ef   :  { %v2531_v44 = vpack.c.bf16 %v2516_v42, %v3922_v34  ;;  %2518 = vst [vmem:[#allocation13] sm:$0xff] %v2516_v42 }
 0x7f1   :  { %3020 = vmatmul.mubr.bf16.gmra.mxu0 %v2531_v44 }
 0x7f2   :  { %3335 = shalt.err (!%p3332_p1)
}
 0x7f3   :  { %2697 = dma.vmem_to_hbm [thread:$0]  %s2695_s11, 128, %s3953_s7, [#allocation14]  }
 0x7f4   :  { %s3407_s15 = smov [#allocation15]  }
 0x7f5   :  { %s2704_s16 = sshll.u32 %s3407_s15, 4  ;;  %s2705_s16 = int_to_ptr.vmem [resolvable:$true] %s2704_s16 }
 0x7f6   :  { %s3344_s17 = scalar_lea.vmem %s2705_s16, 128  ;;  %p3349_p3 = scmp.lt.s32.totalorder %s2705_s16, %s2705_s16 }
 0x7f7   :  { %p3345_p2 = scmp.ne.s32.totalorder %s2705_s16, %s3344_s17  ;;  %p3350_p4 = scmp.lt.s32.totalorder %s3344_s17, %s3344_s17 }
 0x7f9   :  { %p3351_p5 = por %p3350_p4, %p3349_p3 }
 0x7fb   :  { %p3352_p6 = pnand %p3351_p5, %p3345_p2 }
 0x7fd   :  { %3355 = shalt.err (!%p3352_p6)
}
 0x7fe   :  { %2707 = dma.vmem_to_hbm [thread:$0]  %s2705_s16, 128, %s3954_s8, [#allocation14]  }
 0x7ff   :  { %s3408_s7 = smov [#allocation12]  }
 0x800   :  { %s2681_s1 = sshll.u32 %s3408_s7, 4  ;;  %s2682_s1 = int_to_ptr.vmem [resolvable:$true] %s2681_s1 }
 0x801   :  { %s3364_s20 = scalar_lea.vmem %s2682_s1, 1024  ;;  %p3369_p8 = scmp.lt.s32.totalorder %s2682_s1, %s2682_s1 }
 0x802   :  { %p3365_p7 = scmp.ne.s32.totalorder %s2682_s1, %s3364_s20  ;;  %p3370_p9 = scmp.lt.s32.totalorder %s3364_s20, %s3364_s20 }
 0x804   :  { %p3371_p10 = por %p3370_p9, %p3369_p8 }
 0x806   :  { %p3372_p11 = pnand %p3371_p10, %p3365_p7 }
 0x8b1   :  { %v3021_v4 = vpop.f32.mrf.mxu0 }
 0x8b2   :  { %v2662_v5 = vadd.f32 %v3021_v4, %v2978_v58 }
 0x8b3   :  { %v2653_v6 = vpop.f32.mrf.mxu0 }
 0x8b4   :  { %2674 = vst [vmem:[#allocation12 + $0x30] sm:$0xff] %v2662_v5  ;;  %v2654_v7 = vadd.f32 %v2978_v58, %v2653_v6 }
 0x8b5   :  { %v3022_v8 = vpop.f32.mrf.mxu0 }
 0x8b6   :  { %2672 = vst [vmem:[#allocation12 + $0x20] sm:$0xff] %v2654_v7  ;;  %v2665_v12 = vadd.f32 %v3022_v8, %v2978_v58 }
 0x8b7   :  { %v2656_v32 = vpop.f32.mrf.mxu0 }
 0x8b8   :  { %2675 = vst [vmem:[#allocation12 + $0x38] sm:$0xff] %v2665_v12  ;;  %v2657_v33 = vadd.f32 %v2978_v58, %v2656_v32 }
 0x8ba   :  { %2673 = vst [vmem:[#allocation12 + $0x28] sm:$0xff] %v2657_v33 }
 0x8bb   :  { %3375 = shalt.err (!%p3372_p11)
}
 0x8bc   :  { %s3409_s8 = smov 128   ;;  %s3410_s21 = smov 8  }
 0x8bd   :  { %2687 = dma.vmem_to_hbm [thread:$0]  %s2682_s1, 1024, %s3952_s6, [#allocation5], %s3409_s8, %s3409_s8, %s3410_s21  }
 0x8be   :  { %3390 = dma.done.wait [#allocation5], 1024  }
 0x8bf   :  { %3391 = vsyncadd [#allocation5], 4294966272 }
 0x8c0   :  { %3392 = dma.done.wait [#allocation14], 256  }
 0x8c1   :  { %3393 = vsyncadd [#allocation14], 4294967040 }
 0x8c2   :  { %2717 = vsyncpa [#allocation4], 1 }
 0x8c3   :  { %2718 = vsyncpa [#allocation7], 1 }
 0x8c4   :  { %2719 = vsyncpa [#allocation10], 1 }
 0x8c5   :  { %2720 = vsyncpa [#allocation5], 1 }
 0x8c6   :  { %2721 = vsyncpa [#allocation14], 1 }

</bundles_post_ra>
